<compile_context>
chip_gen: v7x
topology: tpu7x:2x2x1
jax: 0.10.0
libtpu: 0.0.40
codegen_flags: <defaults>
</compile_context>

<pallas_src>
import functools

import jax
import jax.numpy as jnp
from jax.experimental import pallas as pl
from jax.experimental.pallas import tpu as pltpu


def _round_up(x, m):
    return (x + m - 1) // m * m


def _chebyshev_cos_m_theta(c, margin):
    """cos(margin * acos(c)) == T_margin(c) exactly for integer margin,
    computed with only multiplies/adds (avoids acos/cos lowering)."""
    if margin == 0:
        return jnp.ones_like(c)
    if margin == 1:
        return c
    t_km2 = jnp.ones_like(c)
    t_km1 = c
    for _ in range(2, int(margin) + 1):
        t_km2, t_km1 = t_km1, 2.0 * c * t_km1 - t_km2
    return t_km1


def _asoftmax_kernel(x_ref, t_ref, inv_wn_ref, w_ref,
                     probs_ref, lrow_ref, correct_ref,
                     *, margin, eps, num_classes, num_features,
                     batch, block_b, bf16_exp):
    i = pl.program_id(0)

    x = x_ref[...]                # (Bt, Dpad), native dtype (bf16 stays bf16)
    t = t_ref[...]                # (Bt, 1) int32
    inv_wn = inv_wn_ref[...]      # (1, Cpad) f32; 0.0 in padded class columns

    eps32 = jnp.float32(eps)

    # Row inverse L2 norms: f32 sums of squares + EUP rsqrt.
    x32 = x.astype(jnp.float32)
    inv_xn = jax.lax.rsqrt(
        jnp.maximum(jnp.sum(x32 * x32, axis=1, keepdims=True), eps32 * eps32))

    # Native-dtype MXU matmul with f32 accumulate; normalization applied
    # post-matmul:  cosine_ij = <x_i, w_j> / (||x_i|| * ||w_j||).
    prec = (jax.lax.Precision.HIGHEST if x_ref.dtype == jnp.float32
            else jax.lax.Precision.DEFAULT)
    raw = jnp.dot(x, w_ref[...], precision=prec,
                  preferred_element_type=jnp.float32)          # (Bt, Cpad)
    cosine = raw * inv_xn * inv_wn

    # Target-class cosine via a single one-hot select.
    cls_idx = jax.lax.broadcasted_iota(jnp.int32, cosine.shape, 1)
    onehot = cls_idx == t
    cos_t = jnp.sum(jnp.where(onehot, cosine, 0.0), axis=1, keepdims=True)
    cos_t = jnp.clip(cos_t, -1.0 + eps, 1.0 - eps)
    numerator = _chebyshev_cos_m_theta(cos_t, margin)          # (Bt, 1)

    # Fused denominator: one exp over the class tile + one reduce.
    #   sum_{j != target, j < C} exp(cos_j)
    #     = sum_{all Cpad cols} exp(cos_j) - (Cpad - C) - exp(cos_target)
    # Padded class columns have cosine exactly 0 (zero W column and zero
    # inv_wn), so each contributes exactly exp(0) = 1 in either precision.
    if bf16_exp:
        # bf16 EUP path (v6e/v7x); correction term in the same precision.
        e_cls = jnp.exp(cosine.astype(jnp.bfloat16)).astype(jnp.float32)
        exp_cos_t = jnp.exp(cos_t.astype(jnp.bfloat16)).astype(jnp.float32)
    else:
        e_cls = jnp.exp(cosine)
        exp_cos_t = jnp.exp(cos_t)
    other_sum = jnp.sum(e_cls, axis=1, keepdims=True) - exp_cos_t
    n_pad_classes = cosine.shape[1] - num_classes
    if n_pad_classes:
        other_sum = other_sum - jnp.float32(n_pad_classes)

    denom = jnp.maximum(jnp.exp(numerator) + other_sum, eps32)
    L = numerator - jnp.log(denom)                             # (Bt, 1)

    # Mask batch-padding rows out of the loss / accuracy contributions.
    row_idx = i * block_b + jax.lax.broadcasted_iota(jnp.int32, (block_b, 1), 0)
    row_valid = row_idx < batch
    lrow_ref[...] = jnp.where(row_valid, L, 0.0)

    # probs = softmax(logits, dim=1) over the real feature columns only.
    # probs_ref is unpadded along features -> no padded column is exp'ed for
    # the output or written back to HBM.
    x_real = x32[:, :num_features]                             # (Bt, Din)
    x_max = jnp.max(x_real, axis=1, keepdims=True)
    shifted = x_real - x_max
    if bf16_exp:
        e = jnp.exp(shifted.astype(jnp.bfloat16)).astype(jnp.float32)
    else:
        e = jnp.exp(shifted)
    s = jnp.sum(e, axis=1, keepdims=True)
    inv_s = pl.reciprocal(s, approx=True)                      # EUP slot
    inv_s = inv_s * (2.0 - s * inv_s)                          # one Newton step
    probs_ref[...] = (e * inv_s).astype(probs_ref.dtype)

    # Accuracy: argmax on the raw logits (softmax is monotone) -- stays off
    # the exp/divide dependency chain.
    feat_idx = jax.lax.broadcasted_iota(jnp.int32, x_real.shape, 1)
    big = jnp.int32(num_features)
    pred = jnp.min(jnp.where(x_real == x_max, feat_idx, big),
                   axis=1, keepdims=True)
    correct_ref[...] = ((pred == t) & row_valid).astype(jnp.float32)


def _resident_block_spec(block_shape, *, single_buffer):
    """Constant-index_map spec for a block fetched once (W^T).  Single
    buffering halves its VMEM footprint when the jax build supports it."""
    index_map = lambda i: (0, 0)
    if single_buffer and hasattr(pl, "Buffered"):
        try:
            return pl.BlockSpec(block_shape, index_map,
                                pipeline_mode=pl.Buffered(1))
        except TypeError:        # older jax without pipeline_mode
            pass
    return pl.BlockSpec(block_shape, index_map)


def angular_softmax(logits, targets, W, *, margin=2, eps=1e-9,
                    single_buffer_w=True):
    """logits: (B, in_features), targets: (B,) int, W: (out_features, in_features)."""
    B, Din = logits.shape
    C = W.shape[0]
    x_item = jnp.dtype(logits.dtype).itemsize
    w_item = jnp.dtype(W.dtype).itemsize

    # Lane / sublane alignment: feature (K) and class (N) axes padded to
    # multiples of 128 only if needed; batch tile rounded to the native
    # dtype's sublane packing (8 f32 / 16 bf16 / 32 int8).
    d_pad = _round_up(Din, 128)
    c_pad = _round_up(C, 128)
    sublane = {1: 32, 2: 16, 4: 8}.get(x_item, 8)
    block_b = min(256, _round_up(B, sublane))
    if B > 128 and _round_up(B, block_b) // block_b < 2:
        # >= 2 batch blocks so the "parallel" axis populates both v7x cores.
        block_b = _round_up(max(128, -(-B // 2)), sublane)
    b_pad = _round_up(B, block_b)
    n_blocks = b_pad // block_b

    # Inputs stay in their native dtype (bf16 weights -> native bf16 MXU).
    # Padding is skipped entirely when the shapes are already aligned.
    logits_p = logits
    if b_pad != B or d_pad != Din:
        logits_p = jnp.pad(logits, ((0, b_pad - B), (0, d_pad - Din)))
    targets_p = targets.astype(jnp.int32).reshape(B, 1)
    if b_pad != B:
        targets_p = jnp.pad(targets_p, ((0, b_pad - B), (0, 0)))

    # W is pre-transposed once (plain NN matmul in the kernel) and its
    # per-class inverse norms are precomputed once in f32, so the kernel
    # never re-normalizes W per batch block.
    w_t = W.T
    if d_pad != Din or c_pad != C:
        w_t = jnp.pad(w_t, ((0, d_pad - Din), (0, c_pad - C)))
    w32 = W.astype(jnp.float32)
    inv_wn = jax.lax.rsqrt(
        jnp.maximum(jnp.sum(w32 * w32, axis=1), jnp.float32(eps) ** 2))
    inv_wn = inv_wn.reshape(1, C)
    if c_pad != C:
        inv_wn = jnp.pad(inv_wn, ((0, 0), (0, c_pad - C)))   # padded classes -> 0

    # bf16 exps only when the inputs are bf16 (keeps the f32 path faithful to
    # the reference; v5e has no bf16 EUP and simply upcasts there).
    bf16_exp = logits.dtype == jnp.bfloat16

    kernel = functools.partial(
        _asoftmax_kernel, margin=margin, eps=eps,
        num_classes=C, num_features=Din, batch=B, block_b=block_b,
        bf16_exp=bf16_exp)

    # Explicit scoped-VMEM budget: resident W^T (single/double buffer),
    # double-buffered x / probs / scalar tiles and f32 temporaries, with
    # ~1.5x headroom, capped below physical VMEM.
    w_bufs = 1 if single_buffer_w else 2
    needed = (d_pad * c_pad * w_item * w_bufs
              + 2 * c_pad * 4                          # inv ||w_j||
              + 2 * block_b * d_pad * x_item           # x tiles
              + 2 * block_b * max(Din, 128) * x_item   # probs tiles
              + 2 * 3 * block_b * 128 * 4              # targets / L / correct
              + 4 * block_b * c_pad * 4                # cosine & exp temporaries
              + 4 * block_b * d_pad * 4)               # f32 x / softmax temporaries
    try:
        vmem_cap = int(pltpu.get_tpu_info().vmem_capacity_bytes)
    except Exception:
        vmem_cap = 64 * 2**20                          # v7x has the smallest VMEM
    vmem_limit = int(min(max(needed * 3 // 2, 32 * 2**20), vmem_cap * 7 // 8))

    cost = pl.CostEstimate(
        flops=int(2 * b_pad * c_pad * d_pad),
        transcendentals=int(b_pad * (c_pad + Din)),
        bytes_accessed=int(B * Din * x_item + C * Din * w_item + B * 4
                           + B * Din * x_item + 2 * b_pad * 4 + c_pad * 4))

    probs_p, l_rows, correct = pl.pallas_call(
        kernel,
        grid=(n_blocks,),
        in_specs=[
            pl.BlockSpec((block_b, d_pad), lambda i: (i, 0)),     # logits rows
            pl.BlockSpec((block_b, 1), lambda i: (i, 0)),         # targets rows
            pl.BlockSpec((1, c_pad), lambda i: (0, 0)),           # 1/||w_j|| (resident)
            _resident_block_spec((d_pad, c_pad),
                                 single_buffer=single_buffer_w),  # W^T (resident)
        ],
        out_specs=(
            pl.BlockSpec((block_b, Din), lambda i: (i, 0)),       # probs (unpadded D)
            pl.BlockSpec((block_b, 1), lambda i: (i, 0)),         # per-row L
            pl.BlockSpec((block_b, 1), lambda i: (i, 0)),         # per-row correct
        ),
        out_shape=(
            jax.ShapeDtypeStruct((b_pad, Din), logits.dtype),
            jax.ShapeDtypeStruct((b_pad, 1), jnp.float32),
            jax.ShapeDtypeStruct((b_pad, 1), jnp.float32),
        ),
        compiler_params=pltpu.CompilerParams(
            dimension_semantics=("parallel",),   # batch blocks shard across TCs
            vmem_limit_bytes=vmem_limit),
        cost_estimate=cost,
    )(logits_p, targets_p, inv_wn, w_t)

    # Tiny cross-block epilogue (O(B) f32 scalars).
    loss = -jnp.sum(l_rows[:B, 0]) / B
    accuracy = jnp.sum(correct[:B, 0]) / B
    probs = probs_p if b_pad == B else probs_p[:B]
    return {"loss": loss, "probs": probs, "accuracy": accuracy}


def _reference(logits, targets, W, *, margin, eps):
    """Pure-JAX mirror of the PyTorch forward, for a light correctness check."""
    x = logits / jnp.maximum(
        jnp.sqrt(jnp.sum(logits * logits, axis=1, keepdims=True)), eps)
    w = W / jnp.maximum(jnp.sqrt(jnp.sum(W * W, axis=1, keepdims=True)), eps)
    cosine = x @ w.T
    cos_t = jnp.take_along_axis(cosine, targets[:, None], axis=1)[:, 0]
    numerator = jnp.cos(margin * jnp.arccos(jnp.clip(cos_t, -1.0 + eps, 1.0 - eps)))
    onehot = jax.nn.one_hot(targets, W.shape[0], dtype=bool)
    other = jnp.sum(jnp.where(onehot, 0.0, jnp.exp(cosine)), axis=1)
    denom = jnp.maximum(jnp.exp(numerator) + other, eps)
    L = numerator - jnp.log(denom)
    probs = jax.nn.softmax(logits, axis=1)
    pred = jnp.argmax(probs, axis=1)
    acc = jnp.mean((pred == targets).astype(jnp.float32))
    return {"loss": -jnp.mean(L), "probs": probs, "accuracy": acc}


if __name__ == "__main__":
    in_features = 2
    out_features = 16
    margin = 2
    eps = 1e-9
    B = 8

    key = jax.random.PRNGKey(0)
    k_w, k_x, k_t = jax.random.split(key, 3)

    # Deterministic Xavier-uniform init for W (out_features, in_features).
    bound = (6.0 / (in_features + out_features)) ** 0.5
    W = jax.random.uniform(k_w, (out_features, in_features),
                           minval=-bound, maxval=bound, dtype=jnp.float32)
    logits = jax.random.normal(k_x, (B, in_features), dtype=jnp.float32)
    targets = jax.random.randint(k_t, (B,), 0, out_features, dtype=jnp.int32)

    fwd = jax.jit(functools.partial(angular_softmax, margin=margin, eps=eps))
    try:
        out = jax.block_until_ready(fwd(logits, targets, W))
    except Exception:
        # Fallback if this jax/Mosaic build rejects single-buffered resident
        # blocks (pipeline_mode=pl.Buffered(1)); everything else is identical.
        fwd = jax.jit(functools.partial(angular_softmax, margin=margin, eps=eps,
                                        single_buffer_w=False))
        out = jax.block_until_ready(fwd(logits, targets, W))

    ref = _reference(logits, targets, W, margin=margin, eps=eps)
    assert jnp.allclose(out["loss"], ref["loss"], rtol=1e-3, atol=1e-5), (
        out["loss"], ref["loss"])
    assert jnp.allclose(out["probs"], ref["probs"], rtol=1e-3, atol=1e-5)
    assert jnp.allclose(out["accuracy"], ref["accuracy"])

    # Smoke-test the bf16 path (native bf16 MXU matmul + bf16 EUP exps),
    # compared against a reference running on the same bf16-rounded inputs.
    logits_bf = logits.astype(jnp.bfloat16)
    W_bf = W.astype(jnp.bfloat16)
    out_bf = jax.block_until_ready(fwd(logits_bf, targets, W_bf))
    ref_bf = _reference(logits_bf.astype(jnp.float32), targets,
                        W_bf.astype(jnp.float32), margin=margin, eps=eps)
    assert out_bf["probs"].dtype == jnp.bfloat16
    assert bool(jnp.isfinite(out_bf["loss"]))
    assert jnp.allclose(out_bf["loss"], ref_bf["loss"], rtol=5e-2, atol=5e-2), (
        out_bf["loss"], ref_bf["loss"])
    assert jnp.allclose(out_bf["accuracy"], ref_bf["accuracy"])

    print("KERNEL_OK")
</pallas_src>

<mosaic_0001>
module attributes {stable_mosaic.version = 11 : i64} {
  func.func @_asoftmax_kernel(%arg0: i32, %arg1: memref<8x128xf32, #tpu.memory_space<vmem>>, %arg2: memref<8x1xi32, #tpu.memory_space<vmem>>, %arg3: memref<1x128xf32, #tpu.memory_space<vmem>>, %arg4: memref<128x128xf32, #tpu.memory_space<vmem>>, %arg5: memref<8x2xf32, #tpu.memory_space<vmem>>, %arg6: memref<8x1xf32, #tpu.memory_space<vmem>>, %arg7: memref<8x1xf32, #tpu.memory_space<vmem>>) attributes {dimension_semantics = [#tpu.dimension_semantics<parallel>], iteration_bounds = array<i64: 1>, scalar_prefetch = 0 : i64, scratch_operands = 0 : i64, tpu.core_type = #tpu.core_type<tc>, window_params = [{transform_indices = @transform_0, window_bounds = array<i64: 8, 128>}, {transform_indices = @transform_1, window_bounds = array<i64: 8, 1>}, {pipeline_mode = #tpu.pipeline_mode<synchronous>, transform_indices = @transform_2, window_bounds = array<i64: 1, 128>}, {pipeline_mode = #tpu.pipeline_mode<synchronous>, transform_indices = @transform_3, window_bounds = array<i64: 128, 128>}, {transform_indices = @transform_4, window_bounds = array<i64: 8, 2>}, {transform_indices = @transform_5, window_bounds = array<i64: 8, 1>}, {transform_indices = @transform_6, window_bounds = array<i64: 8, 1>}]} {
    %c0 = arith.constant 0 : index
    %c0_0 = arith.constant 0 : index
    %0 = vector.load %arg1[%c0, %c0_0] : memref<8x128xf32, #tpu.memory_space<vmem>>, vector<8x128xf32>
    %c0_1 = arith.constant 0 : index
    %c0_2 = arith.constant 0 : index
    %1 = vector.load %arg2[%c0_1, %c0_2] : memref<8x1xi32, #tpu.memory_space<vmem>>, vector<8x1xi32>
    %c0_3 = arith.constant 0 : index
    %c0_4 = arith.constant 0 : index
    %2 = vector.load %arg3[%c0_3, %c0_4] : memref<1x128xf32, #tpu.memory_space<vmem>>, vector<1x128xf32>
    %3 = arith.mulf %0, %0 : vector<8x128xf32>
    %cst = arith.constant dense<0.000000e+00> : vector<8xf32>
    %4 = vector.multi_reduction <add>, %3, %cst [1] : vector<8x128xf32> to vector<8xf32>
    %5 = vector.shape_cast %4 : vector<8xf32> to vector<8x1xf32>
    %cst_5 = arith.constant 9.99999971E-10 : f32
    %cst_6 = arith.constant 9.99999971E-10 : f32
    %6 = arith.mulf %cst_5, %cst_6 : f32
    %7 = vector.broadcast %6 : f32 to vector<8x1xf32>
    %8 = arith.maximumf %5, %7 : vector<8x1xf32>
    %9 = math.rsqrt %8 : vector<8x1xf32>
    %c0_7 = arith.constant 0 : index
    %c0_8 = arith.constant 0 : index
    %10 = vector.load %arg4[%c0_7, %c0_8] : memref<128x128xf32, #tpu.memory_space<vmem>>, vector<128x128xf32>
    %cst_9 = arith.constant dense<0.000000e+00> : vector<8x128xf32>
    %11 = tpu.matmul %0, %10, %cst_9 {dimension_numbers = #tpu.dot_dimension_numbers<[1], [0], [0], [1], [0, 0, 1, 1], [], []>, precision = #tpu.contract_precision<fp32>} : vector<8x128xf32>, vector<128x128xf32>, vector<8x128xf32> -> vector<8x128xf32>
    %12 = vector.broadcast %9 : vector<8x1xf32> to vector<8x128xf32>
    %13 = arith.mulf %11, %12 : vector<8x128xf32>
    %14 = vector.broadcast %2 : vector<1x128xf32> to vector<8x128xf32>
    %15 = arith.mulf %13, %14 : vector<8x128xf32>
    %16 = tpu.iota {dimensions = array<i32: 1>} : vector<8x128xi32>
    %17 = vector.broadcast %1 : vector<8x1xi32> to vector<8x128xi32>
    %18 = arith.cmpi eq, %16, %17 : vector<8x128xi32>
    %cst_10 = arith.constant 0.000000e+00 : f32
    %19 = vector.broadcast %cst_10 : f32 to vector<8x128xf32>
    %20 = arith.select %18, %15, %19 : vector<8x128xi1>, vector<8x128xf32>
    %cst_11 = arith.constant dense<0.000000e+00> : vector<8xf32>
    %21 = vector.multi_reduction <add>, %20, %cst_11 [1] : vector<8x128xf32> to vector<8xf32>
    %22 = vector.shape_cast %21 : vector<8xf32> to vector<8x1xf32>
    %cst_12 = arith.constant -1.000000e+00 : f32
    %cst_13 = arith.constant 1.000000e+00 : f32
    %23 = vector.broadcast %cst_12 : f32 to vector<8x1xf32>
    %24 = arith.maximumf %23, %22 : vector<8x1xf32>
    %25 = vector.broadcast %cst_13 : f32 to vector<8x1xf32>
    %26 = arith.minimumf %25, %24 : vector<8x1xf32>
    %cst_14 = arith.constant 1.000000e+00 : f32
    %27 = vector.broadcast %cst_14 : f32 to vector<8x1xf32>
    %cst_15 = arith.constant 2.000000e+00 : f32
    %28 = vector.broadcast %cst_15 : f32 to vector<8x1xf32>
    %29 = arith.mulf %28, %26 : vector<8x1xf32>
    %30 = arith.mulf %29, %26 : vector<8x1xf32>
    %31 = arith.subf %30, %27 : vector<8x1xf32>
    %32 = math.exp %15 : vector<8x128xf32>
    %33 = math.exp %26 : vector<8x1xf32>
    %cst_16 = arith.constant dense<0.000000e+00> : vector<8xf32>
    %34 = vector.multi_reduction <add>, %32, %cst_16 [1] : vector<8x128xf32> to vector<8xf32>
    %35 = vector.shape_cast %34 : vector<8xf32> to vector<8x1xf32>
    %36 = arith.subf %35, %33 : vector<8x1xf32>
    %cst_17 = arith.constant 1.120000e+02 : f32
    %37 = vector.broadcast %cst_17 : f32 to vector<8x1xf32>
    %38 = arith.subf %36, %37 : vector<8x1xf32>
    %39 = math.exp %31 : vector<8x1xf32>
    %40 = arith.addf %39, %38 : vector<8x1xf32>
    %cst_18 = arith.constant 9.99999971E-10 : f32
    %41 = vector.broadcast %cst_18 : f32 to vector<8x1xf32>
    %42 = arith.maximumf %40, %41 : vector<8x1xf32>
    %43 = math.log %42 : vector<8x1xf32>
    %44 = arith.subf %31, %43 : vector<8x1xf32>
    %c8_i32 = arith.constant 8 : i32
    %45 = arith.muli %arg0, %c8_i32 : i32
    %46 = tpu.iota {dimensions = array<i32: 0>} : vector<8x1xi32>
    %47 = vector.broadcast %45 : i32 to vector<8x1xi32>
    %48 = arith.addi %47, %46 : vector<8x1xi32>
    %c8_i32_19 = arith.constant 8 : i32
    %49 = vector.broadcast %c8_i32_19 : i32 to vector<8x1xi32>
    %50 = arith.cmpi slt, %48, %49 : vector<8x1xi32>
    %cst_20 = arith.constant 0.000000e+00 : f32
    %51 = vector.broadcast %cst_20 : f32 to vector<8x1xf32>
    %52 = arith.select %50, %44, %51 : vector<8x1xi1>, vector<8x1xf32>
    %c0_21 = arith.constant 0 : index
    %c0_22 = arith.constant 0 : index
    %53 = vector.load %arg6[%c0_21, %c0_22] : memref<8x1xf32, #tpu.memory_space<vmem>>, vector<8x1xf32>
    tpu.vector_store %arg6[%c0_21, %c0_22], %52 {strides = array<i32>} : memref<8x1xf32, #tpu.memory_space<vmem>>, vector<8x1xf32>,
    %54 = vector.extract_strided_slice %0 {offsets = [0, 0], sizes = [8, 2], strides = [1, 1]} : vector<8x128xf32> to vector<8x2xf32>
    %cst_23 = arith.constant dense<0xFF800000> : vector<8xf32>
    %55 = vector.multi_reduction <maximumf>, %54, %cst_23 [1] : vector<8x2xf32> to vector<8xf32>
    %56 = vector.shape_cast %55 : vector<8xf32> to vector<8x1xf32>
    %57 = vector.broadcast %56 : vector<8x1xf32> to vector<8x2xf32>
    %58 = arith.subf %54, %57 : vector<8x2xf32>
    %59 = math.exp %58 : vector<8x2xf32>
    %cst_24 = arith.constant dense<0.000000e+00> : vector<8xf32>
    %60 = vector.multi_reduction <add>, %59, %cst_24 [1] : vector<8x2xf32> to vector<8xf32>
    %61 = vector.shape_cast %60 : vector<8xf32> to vector<8x1xf32>
    %62 = tpu.reciprocal %61 {approx = true} : vector<8x1xf32> -> vector<8x1xf32>
    %63 = arith.mulf %61, %62 : vector<8x1xf32>
    %cst_25 = arith.constant 2.000000e+00 : f32
    %64 = vector.broadcast %cst_25 : f32 to vector<8x1xf32>
    %65 = arith.subf %64, %63 : vector<8x1xf32>
    %66 = arith.mulf %62, %65 : vector<8x1xf32>
    %67 = vector.broadcast %66 : vector<8x1xf32> to vector<8x2xf32>
    %68 = arith.mulf %59, %67 : vector<8x2xf32>
    %c0_26 = arith.constant 0 : index
    %c0_27 = arith.constant 0 : index
    %69 = vector.load %arg5[%c0_26, %c0_27] : memref<8x2xf32, #tpu.memory_space<vmem>>, vector<8x2xf32>
    tpu.vector_store %arg5[%c0_26, %c0_27], %68 {strides = array<i32>} : memref<8x2xf32, #tpu.memory_space<vmem>>, vector<8x2xf32>,
    %70 = tpu.iota {dimensions = array<i32: 1>} : vector<8x2xi32>
    %71 = vector.broadcast %56 : vector<8x1xf32> to vector<8x2xf32>
    %72 = arith.cmpf oeq, %54, %71 : vector<8x2xf32>
    %c2_i32 = arith.constant 2 : i32
    %73 = vector.broadcast %c2_i32 : i32 to vector<8x2xi32>
    %74 = arith.select %72, %70, %73 : vector<8x2xi1>, vector<8x2xi32>
    %cst_28 = arith.constant dense<2147483647> : vector<8xi32>
    %75 = vector.multi_reduction <minsi>, %74, %cst_28 [1] : vector<8x2xi32> to vector<8xi32>
    %76 = vector.shape_cast %75 : vector<8xi32> to vector<8x1xi32>
    %77 = arith.cmpi eq, %76, %1 : vector<8x1xi32>
    %78 = arith.andi %77, %50 : vector<8x1xi1>
    %79 = arith.extui %78 : vector<8x1xi1> to vector<8x1xi32>
    %80 = arith.sitofp %79 : vector<8x1xi32> to vector<8x1xf32>
    %c0_29 = arith.constant 0 : index
    %c0_30 = arith.constant 0 : index
    %81 = vector.load %arg7[%c0_29, %c0_30] : memref<8x1xf32, #tpu.memory_space<vmem>>, vector<8x1xf32>
    tpu.vector_store %arg7[%c0_29, %c0_30], %80 {strides = array<i32>} : memref<8x1xf32, #tpu.memory_space<vmem>>, vector<8x1xf32>,
    return
  }
  func.func @transform_0(%arg0: i32) -> (i32, i32) {
    %c0_i32 = arith.constant 0 : i32
    %c0_i32_0 = arith.constant 0 : i32
    return %arg0, %c0_i32 : i32, i32
  }
  func.func @transform_1(%arg0: i32) -> (i32, i32) {
    %c0_i32 = arith.constant 0 : i32
    %c0_i32_0 = arith.constant 0 : i32
    return %arg0, %c0_i32 : i32, i32
  }
  func.func @transform_2(%arg0: i32) -> (i32, i32) {
    %c0_i32 = arith.constant 0 : i32
    %c0_i32_0 = arith.constant 0 : i32
    %c0_i32_1 = arith.constant 0 : i32
    return %c0_i32, %c0_i32_0 : i32, i32
  }
  func.func @transform_3(%arg0: i32) -> (i32, i32) {
    %c0_i32 = arith.constant 0 : i32
    %c0_i32_0 = arith.constant 0 : i32
    %c0_i32_1 = arith.constant 0 : i32
    return %c0_i32, %c0_i32_0 : i32, i32
  }
  func.func @transform_4(%arg0: i32) -> (i32, i32) {
    %c0_i32 = arith.constant 0 : i32
    %c0_i32_0 = arith.constant 0 : i32
    return %arg0, %c0_i32 : i32, i32
  }
  func.func @transform_5(%arg0: i32) -> (i32, i32) {
    %c0_i32 = arith.constant 0 : i32
    %c0_i32_0 = arith.constant 0 : i32
    return %arg0, %c0_i32 : i32, i32
  }
  func.func @transform_6(%arg0: i32) -> (i32, i32) {
    %c0_i32 = arith.constant 0 : i32
    %c0_i32_0 = arith.constant 0 : i32
    return %arg0, %c0_i32 : i32, i32
  }
}

module attributes {stable_mosaic.version = 11 : i64} {
  func.func @_asoftmax_kernel(%arg0: i32, %arg1: memref<8x128xf32, #tpu.memory_space<vmem>>, %arg2: memref<8x1xi32, #tpu.memory_space<vmem>>, %arg3: memref<1x128xf32, #tpu.memory_space<vmem>>, %arg4: memref<128x128xf32, #tpu.memory_space<vmem>>, %arg5: memref<8x2xf32, #tpu.memory_space<vmem>>, %arg6: memref<8x1xf32, #tpu.memory_space<vmem>>, %arg7: memref<8x1xf32, #tpu.memory_space<vmem>>) attributes {dimension_semantics = [#tpu.dimension_semantics<parallel>], iteration_bounds = array<i64: 1>, scalar_prefetch = 0 : i64, scratch_operands = 0 : i64, tpu.core_type = #tpu.core_type<tc>, window_params = [{transform_indices = @transform_0, window_bounds = array<i64: 8, 128>}, {transform_indices = @transform_1, window_bounds = array<i64: 8, 1>}, {pipeline_mode = #tpu.pipeline_mode<synchronous>, transform_indices = @transform_2, window_bounds = array<i64: 1, 128>}, {pipeline_mode = #tpu.pipeline_mode<synchronous>, transform_indices = @transform_3, window_bounds = array<i64: 128, 128>}, {transform_indices = @transform_4, window_bounds = array<i64: 8, 2>}, {transform_indices = @transform_5, window_bounds = array<i64: 8, 1>}, {transform_indices = @transform_6, window_bounds = array<i64: 8, 1>}]} {
    %c0 = arith.constant 0 : index
    %c0_0 = arith.constant 0 : index
    %0 = vector.load %arg1[%c0, %c0_0] : memref<8x128xf32, #tpu.memory_space<vmem>>, vector<8x128xf32>
    %c0_1 = arith.constant 0 : index
    %c0_2 = arith.constant 0 : index
    %1 = vector.load %arg2[%c0_1, %c0_2] : memref<8x1xi32, #tpu.memory_space<vmem>>, vector<8x1xi32>
    %c0_3 = arith.constant 0 : index
    %c0_4 = arith.constant 0 : index
    %2 = vector.load %arg3[%c0_3, %c0_4] : memref<1x128xf32, #tpu.memory_space<vmem>>, vector<1x128xf32>
    %3 = arith.mulf %0, %0 : vector<8x128xf32>
    %cst = arith.constant dense<0.000000e+00> : vector<8xf32>
    %4 = vector.multi_reduction <add>, %3, %cst [1] : vector<8x128xf32> to vector<8xf32>
    %5 = vector.shape_cast %4 : vector<8xf32> to vector<8x1xf32>
    %cst_5 = arith.constant 9.99999971E-10 : f32
    %cst_6 = arith.constant 9.99999971E-10 : f32
    %6 = arith.mulf %cst_5, %cst_6 : f32
    %7 = vector.broadcast %6 : f32 to vector<8x1xf32>
    %8 = arith.maximumf %5, %7 : vector<8x1xf32>
    %9 = math.rsqrt %8 : vector<8x1xf32>
    %c0_7 = arith.constant 0 : index
    %c0_8 = arith.constant 0 : index
    %10 = vector.load %arg4[%c0_7, %c0_8] : memref<128x128xf32, #tpu.memory_space<vmem>>, vector<128x128xf32>
    %cst_9 = arith.constant dense<0.000000e+00> : vector<8x128xf32>
    %11 = tpu.matmul %0, %10, %cst_9 {dimension_numbers = #tpu.dot_dimension_numbers<[1], [0], [0], [1], [0, 0, 1, 1], [], []>, precision = #tpu.contract_precision<fp32>} : vector<8x128xf32>, vector<128x128xf32>, vector<8x128xf32> -> vector<8x128xf32>
    %12 = vector.broadcast %9 : vector<8x1xf32> to vector<8x128xf32>
    %13 = arith.mulf %11, %12 : vector<8x128xf32>
    %14 = vector.broadcast %2 : vector<1x128xf32> to vector<8x128xf32>
    %15 = arith.mulf %13, %14 : vector<8x128xf32>
    %16 = tpu.iota {dimensions = array<i32: 1>} : vector<8x128xi32>
    %17 = vector.broadcast %1 : vector<8x1xi32> to vector<8x128xi32>
    %18 = arith.cmpi eq, %16, %17 : vector<8x128xi32>
    %cst_10 = arith.constant 0.000000e+00 : f32
    %19 = vector.broadcast %cst_10 : f32 to vector<8x128xf32>
    %20 = arith.select %18, %15, %19 : vector<8x128xi1>, vector<8x128xf32>
    %cst_11 = arith.constant dense<0.000000e+00> : vector<8xf32>
    %21 = vector.multi_reduction <add>, %20, %cst_11 [1] : vector<8x128xf32> to vector<8xf32>
    %22 = vector.shape_cast %21 : vector<8xf32> to vector<8x1xf32>
    %cst_12 = arith.constant -1.000000e+00 : f32
    %cst_13 = arith.constant 1.000000e+00 : f32
    %23 = vector.broadcast %cst_12 : f32 to vector<8x1xf32>
    %24 = arith.maximumf %23, %22 : vector<8x1xf32>
    %25 = vector.broadcast %cst_13 : f32 to vector<8x1xf32>
    %26 = arith.minimumf %25, %24 : vector<8x1xf32>
    %cst_14 = arith.constant 1.000000e+00 : f32
    %27 = vector.broadcast %cst_14 : f32 to vector<8x1xf32>
    %cst_15 = arith.constant 2.000000e+00 : f32
    %28 = vector.broadcast %cst_15 : f32 to vector<8x1xf32>
    %29 = arith.mulf %28, %26 : vector<8x1xf32>
    %30 = arith.mulf %29, %26 : vector<8x1xf32>
    %31 = arith.subf %30, %27 : vector<8x1xf32>
    %32 = math.exp %15 : vector<8x128xf32>
    %33 = math.exp %26 : vector<8x1xf32>
    %cst_16 = arith.constant dense<0.000000e+00> : vector<8xf32>
    %34 = vector.multi_reduction <add>, %32, %cst_16 [1] : vector<8x128xf32> to vector<8xf32>
    %35 = vector.shape_cast %34 : vector<8xf32> to vector<8x1xf32>
    %36 = arith.subf %35, %33 : vector<8x1xf32>
    %cst_17 = arith.constant 1.120000e+02 : f32
    %37 = vector.broadcast %cst_17 : f32 to vector<8x1xf32>
    %38 = arith.subf %36, %37 : vector<8x1xf32>
    %39 = math.exp %31 : vector<8x1xf32>
    %40 = arith.addf %39, %38 : vector<8x1xf32>
    %cst_18 = arith.constant 9.99999971E-10 : f32
    %41 = vector.broadcast %cst_18 : f32 to vector<8x1xf32>
    %42 = arith.maximumf %40, %41 : vector<8x1xf32>
    %43 = math.log %42 : vector<8x1xf32>
    %44 = arith.subf %31, %43 : vector<8x1xf32>
    %c8_i32 = arith.constant 8 : i32
    %45 = arith.muli %arg0, %c8_i32 : i32
    %46 = tpu.iota {dimensions = array<i32: 0>} : vector<8x1xi32>
    %47 = vector.broadcast %45 : i32 to vector<8x1xi32>
    %48 = arith.addi %47, %46 : vector<8x1xi32>
    %c8_i32_19 = arith.constant 8 : i32
    %49 = vector.broadcast %c8_i32_19 : i32 to vector<8x1xi32>
    %50 = arith.cmpi slt, %48, %49 : vector<8x1xi32>
    %cst_20 = arith.constant 0.000000e+00 : f32
    %51 = vector.broadcast %cst_20 : f32 to vector<8x1xf32>
    %52 = arith.select %50, %44, %51 : vector<8x1xi1>, vector<8x1xf32>
    %c0_21 = arith.constant 0 : index
    %c0_22 = arith.constant 0 : index
    %53 = vector.load %arg6[%c0_21, %c0_22] : memref<8x1xf32, #tpu.memory_space<vmem>>, vector<8x1xf32>
    tpu.vector_store %arg6[%c0_21, %c0_22], %52 {strides = array<i32>} : memref<8x1xf32, #tpu.memory_space<vmem>>, vector<8x1xf32>,
    %54 = vector.extract_strided_slice %0 {offsets = [0, 0], sizes = [8, 2], strides = [1, 1]} : vector<8x128xf32> to vector<8x2xf32>
    %cst_23 = arith.constant dense<0xFF800000> : vector<8xf32>
    %55 = vector.multi_reduction <maximumf>, %54, %cst_23 [1] : vector<8x2xf32> to vector<8xf32>
    %56 = vector.shape_cast %55 : vector<8xf32> to vector<8x1xf32>
    %57 = vector.broadcast %56 : vector<8x1xf32> to vector<8x2xf32>
    %58 = arith.subf %54, %57 : vector<8x2xf32>
    %59 = math.exp %58 : vector<8x2xf32>
    %cst_24 = arith.constant dense<0.000000e+00> : vector<8xf32>
    %60 = vector.multi_reduction <add>, %59, %cst_24 [1] : vector<8x2xf32> to vector<8xf32>
    %61 = vector.shape_cast %60 : vector<8xf32> to vector<8x1xf32>
    %62 = tpu.reciprocal %61 {approx = true} : vector<8x1xf32> -> vector<8x1xf32>
    %63 = arith.mulf %61, %62 : vector<8x1xf32>
    %cst_25 = arith.constant 2.000000e+00 : f32
    %64 = vector.broadcast %cst_25 : f32 to vector<8x1xf32>
    %65 = arith.subf %64, %63 : vector<8x1xf32>
    %66 = arith.mulf %62, %65 : vector<8x1xf32>
    %67 = vector.broadcast %66 : vector<8x1xf32> to vector<8x2xf32>
    %68 = arith.mulf %59, %67 : vector<8x2xf32>
    %c0_26 = arith.constant 0 : index
    %c0_27 = arith.constant 0 : index
    %69 = vector.load %arg5[%c0_26, %c0_27] : memref<8x2xf32, #tpu.memory_space<vmem>>, vector<8x2xf32>
    tpu.vector_store %arg5[%c0_26, %c0_27], %68 {strides = array<i32>} : memref<8x2xf32, #tpu.memory_space<vmem>>, vector<8x2xf32>,
    %70 = tpu.iota {dimensions = array<i32: 1>} : vector<8x2xi32>
    %71 = vector.broadcast %56 : vector<8x1xf32> to vector<8x2xf32>
    %72 = arith.cmpf oeq, %54, %71 : vector<8x2xf32>
    %c2_i32 = arith.constant 2 : i32
    %73 = vector.broadcast %c2_i32 : i32 to vector<8x2xi32>
    %74 = arith.select %72, %70, %73 : vector<8x2xi1>, vector<8x2xi32>
    %cst_28 = arith.constant dense<2147483647> : vector<8xi32>
    %75 = vector.multi_reduction <minsi>, %74, %cst_28 [1] : vector<8x2xi32> to vector<8xi32>
    %76 = vector.shape_cast %75 : vector<8xi32> to vector<8x1xi32>
    %77 = arith.cmpi eq, %76, %1 : vector<8x1xi32>
    %78 = arith.andi %77, %50 : vector<8x1xi1>
    %79 = arith.extui %78 : vector<8x1xi1> to vector<8x1xi32>
    %80 = arith.sitofp %79 : vector<8x1xi32> to vector<8x1xf32>
    %c0_29 = arith.constant 0 : index
    %c0_30 = arith.constant 0 : index
    %81 = vector.load %arg7[%c0_29, %c0_30] : memref<8x1xf32, #tpu.memory_space<vmem>>, vector<8x1xf32>
    tpu.vector_store %arg7[%c0_29, %c0_30], %80 {strides = array<i32>} : memref<8x1xf32, #tpu.memory_space<vmem>>, vector<8x1xf32>,
    return
  }
  func.func @transform_0(%arg0: i32) -> (i32, i32) {
    %c0_i32 = arith.constant 0 : i32
    %c0_i32_0 = arith.constant 0 : i32
    return %arg0, %c0_i32 : i32, i32
  }
  func.func @transform_1(%arg0: i32) -> (i32, i32) {
    %c0_i32 = arith.constant 0 : i32
    %c0_i32_0 = arith.constant 0 : i32
    return %arg0, %c0_i32 : i32, i32
  }
  func.func @transform_2(%arg0: i32) -> (i32, i32) {
    %c0_i32 = arith.constant 0 : i32
    %c0_i32_0 = arith.constant 0 : i32
    %c0_i32_1 = arith.constant 0 : i32
    return %c0_i32, %c0_i32_0 : i32, i32
  }
  func.func @transform_3(%arg0: i32) -> (i32, i32) {
    %c0_i32 = arith.constant 0 : i32
    %c0_i32_0 = arith.constant 0 : i32
    %c0_i32_1 = arith.constant 0 : i32
    return %c0_i32, %c0_i32_0 : i32, i32
  }
  func.func @transform_4(%arg0: i32) -> (i32, i32) {
    %c0_i32 = arith.constant 0 : i32
    %c0_i32_0 = arith.constant 0 : i32
    return %arg0, %c0_i32 : i32, i32
  }
  func.func @transform_5(%arg0: i32) -> (i32, i32) {
    %c0_i32 = arith.constant 0 : i32
    %c0_i32_0 = arith.constant 0 : i32
    return %arg0, %c0_i32 : i32, i32
  }
  func.func @transform_6(%arg0: i32) -> (i32, i32) {
    %c0_i32 = arith.constant 0 : i32
    %c0_i32_0 = arith.constant 0 : i32
    return %arg0, %c0_i32 : i32, i32
  }
}

</mosaic_0001>

<bundles_post_ra>
// kernel: angular_softmax.1
= control target key start
LH: loop header
LB: loop body
LE: loop exit
PB: predicated region body
PF: predicated region fallthrough
CT: control target
= control target key end

     0   :  { %vm731_vm0 = vcmask 15360   ;;  %v1271_v1 = vmov 0.0|0.0   ;;  %vm1272_vm1 = vmmov 0   ;;  %v1273_v9 = vmov 0.0   ;;  %s1643_s0 = inlined_call_operand.vmem [shape: f32[8,128], index: 0, kind: input, shape index: {}]   ;;  %s1644_s3 = inlined_call_operand.vmem [shape: f32[128,128], index: 3, kind: input, shape index: {}]   ;;  %s1645_s1 = inlined_call_operand.vmem [shape: s32[8,1], index: 1, kind: input, shape index: {}]   ;;  %s1646_s2 = inlined_call_operand.vmem [shape: f32[1,128], index: 2, kind: input, shape index: {}]   ;;  %s1647_s6 = inlined_call_operand.vmem [shape: f32[8,1], index: 6, kind: output, shape index: {2}]   ;;  %s1648_s4 = inlined_call_operand.vmem [shape: f32[8,2], index: 4, kind: output, shape index: {0}]   ;;  %s1649_s5 = inlined_call_operand.vmem [shape: f32[8,1], index: 5, kind: output, shape index: {1}]  }
   0x1   :  { %v1313_v0 = vld [vmem:[%s1643_s0] sm:$0xff]  ;;  %1098 = vmatprep.subr.bf16.mxu1 %v1271_v1  ;;  %1170 = vmatprep.subr.bf16.mxu0 %v1271_v1  ;;  %v29_v3 = vld [vmem:[%s1644_s3 + $0x8] sm:$0xff]  ;;  %v30_v7 = vld [vmem:[%s1644_s3 + $0x10] sm:$0xff]  ;;  %v1274_v14 = vmov 0   ;;  %vm729_vm5 = vcmask 7168  }
   0x2   :  { %v28_v2 = vld [vmem:[%s1644_s3] sm:$0xff]  ;;  %v732_v4 = vsel %vm731_vm0, %v1313_v0, -inf  ;;  %v48_v6 = vand.u32 4294901760, %v29_v3  ;;  %v31_v8 = vld [vmem:[%s1644_s3 + $0x18] sm:$0xff]  ;;  %920 = vmatprep.mubr.msk.f32.mxu1 %vm1272_vm1, %v1273_v9  ;;  %1025 = vmatprep.mubr.msk.f32.mxu0 %vm1272_vm1, %v1273_v9  ;;  %v51_v10 = vand.u32 4294901760, %v30_v7  ;;  %v33_v13 = vld [vmem:[%s1644_s3 + $0x28] sm:$0xff] }
   0x3   :  { %v45_v5 = vand.u32 4294901760, %v28_v2  ;;  %733 = vmax.xlane.f32.xlu0 %v732_v4  ;;  %v54_v11 = vand.u32 4294901760, %v31_v8  ;;  %v32_v12 = vld [vmem:[%s1644_s3 + $0x20] sm:$0xff]  ;;  %1255 = vset.pattern.permute.xlu1 %v1274_v14  ;;  %v60_v18 = vand.u32 4294901760, %v33_v13  ;;  %v34_v20 = vld [vmem:[%s1644_s3 + $0x30] sm:$0xff]  ;;  %v35_v21 = vld [vmem:[%s1644_s3 + $0x38] sm:$0xff] }
   0x4   :  { %1256 = vset.pattern.permute.xlu0 %v1274_v14  ;;  %v57_v17 = vand.u32 4294901760, %v32_v12  ;;  %v1350_v19 = vld [vmem:[%s1645_s1] sm:$0xff]  ;;  %v63_v23 = vand.u32 4294901760, %v34_v20  ;;  %v66_v24 = vand.u32 4294901760, %v35_v21  ;;  %v1375_v26 = vld [vmem:[%s1644_s3 + $0x48] sm:$0xff]  ;;  %v1388_v30 = vld [vmem:[%s1644_s3 + $0x50] sm:$0xff]  ;;  %v1400_v34 = vsub.f32 %v29_v3, %v48_v6 }
   0x5   :  { %v1341_v15 = vpack.c.bf16 %v48_v6, %v45_v5  ;;  %v1345_v16 = vpack.c.bf16 %v54_v11, %v51_v10  ;;  %696 = vperm.xlu1 %1255, %v1350_v19   ;;  %v1370_v25 = vld [vmem:[%s1644_s3 + $0x40] sm:$0xff]  ;;  %v72_v29 = vand.u32 4294901760, %v1375_v26  ;;  %v1393_v31 = vld [vmem:[%s1644_s3 + $0x58] sm:$0xff]  ;;  %v1395_v32 = vsub.f32 %v28_v2, %v45_v5  ;;  %v1418_v39 = vld [vmem:[%s1644_s3 + $0x68] sm:$0xff] }
   0x6   :  { %v1363_v22 = vpack.c.bf16 %v60_v18, %v57_v17  ;;  %v1379_v27 = vpack.c.bf16 %v66_v24, %v63_v23  ;;  %v69_v28 = vand.u32 4294901760, %v1370_v25  ;;  %v1398_v33 = vand.u32 4294901760, %v1313_v0  ;;  %v1411_v38 = vld [vmem:[%s1644_s3 + $0x60] sm:$0xff]  ;;  %v1441_v46 = vld [vmem:[%s1644_s3 + $0x70] sm:$0xff]  ;;  %v1446_v47 = vld [vmem:[%s1644_s3 + $0x78] sm:$0xff] }
   0x7   :  { %1100 = vmatpush3.bf16.msra.mxu1 %v1341_v15  ;;  %1172 = vmatpush3.bf16.msra.mxu0 %v1341_v15  ;;  %v75_v36 = vand.u32 4294901760, %v1388_v30  ;;  %v78_v37 = vand.u32 4294901760, %v1393_v31  ;;  %v1420_v40 = vsub.f32 %v30_v7, %v51_v10  ;;  %v1422_v41 = vsub.f32 %v31_v8, %v54_v11 }
   0x8   :  { %1101 = vmatprep.subr.bf16.mxu1 %v1271_v1  ;;  %1173 = vmatprep.subr.bf16.mxu0 %v1271_v1  ;;  %v1404_v35 = vpack.c.bf16 %v72_v29, %v69_v28  ;;  %v81_v42 = vand.u32 4294901760, %v1411_v38  ;;  %v1427_v43 = vsub.f32 %v1313_v0, %v1398_v33  ;;  %v84_v45 = vand.u32 4294901760, %v1418_v39 }
   0x9   :  { %v1435_v44 = vpack.c.bf16 %v78_v37, %v75_v36  ;;  %v138_v48 = vand.u32 4294901760, %v1395_v32  ;;  %v145_v49 = vand.u32 4294901760, %v1400_v34  ;;  %v1452_v50 = vsub.f32 %v32_v12, %v57_v17 }
   0xa   :  { %v1454_v51 = vsub.f32 %v33_v13, %v60_v18  ;;  %v87_v52 = vand.u32 4294901760, %v1441_v46  ;;  %v90_v53 = vand.u32 4294901760, %v1446_v47  ;;  %v127_v54 = vand.u32 4294901760, %v1427_v43 }
   0xb   :  { %1103 = vmatpush3.bf16.msra.mxu1 %v1345_v16  ;;  %1175 = vmatpush3.bf16.msra.mxu0 %v1345_v16  ;;  %v152_v55 = vand.u32 4294901760, %v1420_v40  ;;  %v1466_v56 = vpack.c.bf16 %v84_v45, %v81_v42  ;;  %v139_v57 = vsub.f32 %v1395_v32, %v138_v48  ;;  %v146_v58 = vsub.f32 %v1400_v34, %v145_v49 }
   0xc   :  { %1104 = vmatprep.subr.bf16.mxu1 %v1271_v1  ;;  %1176 = vmatprep.subr.bf16.mxu0 %v1271_v1  ;;  %v159_v59 = vand.u32 4294901760, %v1422_v41  ;;  %v1473_v60 = vsub.f32 %v34_v20, %v63_v23  ;;  %v1475_v61 = vsub.f32 %v35_v21, %v66_v24  ;;  %v128_v62 = vsub.f32 %v1427_v43, %v127_v54 }
   0xd   :  { %v153_v63 = vsub.f32 %v1420_v40, %v152_v55  ;;  %v166_v2 = vand.u32 4294901760, %v1452_v50  ;;  %v173_v3 = vand.u32 4294901760, %v1454_v51  ;;  %v1487_v4 = vpack.c.bf16 %v90_v53, %v87_v52 }
   0xe   :  { %v140_v5 = vand.u32 4294901760, %v139_v57  ;;  %v147_v6 = vand.u32 4294901760, %v146_v58  ;;  %v160_v7 = vsub.f32 %v1422_v41, %v159_v59  ;;  %v1493_v8 = vsub.f32 %v1370_v25, %v69_v28 }
   0xf   :  { %1106 = vmatpush3.bf16.msra.mxu1 %v1363_v22  ;;  %1178 = vmatpush3.bf16.msra.mxu0 %v1363_v22  ;;  %v1496_v10 = vsub.f32 %v1375_v26, %v72_v29  ;;  %v1195_v11 = vpack.c.bf16 %v145_v49, %v138_v48  ;;  %v23_v12 = vmul.f32 %v1313_v0, %v1313_v0  ;;  %v129_v13 = vand.u32 4294901760, %v128_v62 }
  0x10   :  { %1107 = vmatprep.subr.bf16.mxu1 %v1271_v1  ;;  %1179 = vmatprep.subr.bf16.mxu0 %v1271_v1  ;;  %v154_v14 = vand.u32 4294901760, %v153_v63  ;;  %v167_v17 = vsub.f32 %v1452_v50, %v166_v2  ;;  %v174_v18 = vsub.f32 %v1454_v51, %v173_v3  ;;  %v1123_v20 = vpack.c.bf16 %v147_v6, %v140_v5 }
  0x11   :  { %v161_v21 = vand.u32 4294901760, %v160_v7  ;;  %v180_v23 = vand.u32 4294901760, %v1473_v60  ;;  %v187_v24 = vand.u32 4294901760, %v1475_v61  ;;  %v1511_v25 = vsub.f32 %v1388_v30, %v75_v36  ;;  %24 = vadd.xlane.f32.xlu0 %v23_v12 }
  0x12   :  { %v1516_v26 = vsub.f32 %v1393_v31, %v78_v37  ;;  %v1198_v28 = vpack.c.bf16 %v159_v59, %v152_v55  ;;  %v168_v29 = vand.u32 4294901760, %v167_v17  ;;  %v194_v48 = vand.u32 4294901760, %v1493_v8 }
  0x13   :  { %1109 = vmatpush3.bf16.msra.mxu1 %v1379_v27  ;;  %1181 = vmatpush3.bf16.msra.mxu0 %v1379_v27  ;;  %v201_v49 = vand.u32 4294901760, %v1496_v10  ;;  %v1126_v57 = vpack.c.bf16 %v161_v21, %v154_v14  ;;  %v175_v58 = vand.u32 4294901760, %v174_v18  ;;  %v181_v30 = vsub.f32 %v1473_v60, %v180_v23 }
  0x14   :  { %1110 = vmatprep.subr.bf16.mxu1 %v1271_v1  ;;  %1182 = vmatprep.subr.bf16.mxu0 %v1271_v1  ;;  %v188_v36 = vsub.f32 %v1475_v61, %v187_v24  ;;  %v1527_v31 = vsub.f32 %v1411_v38, %v81_v42  ;;  %v1532_v37 = vsub.f32 %v1418_v39, %v84_v45  ;;  %v208_v62 = vand.u32 4294901760, %v1511_v25 }
  0x15   :  { %v195_v55 = vsub.f32 %v1493_v8, %v194_v48  ;;  %v202_v59 = vsub.f32 %v1496_v10, %v201_v49  ;;  %v1129_v38 = vpack.c.bf16 %v175_v58, %v168_v29  ;;  %v182_v42 = vand.u32 4294901760, %v181_v30 }
  0x16   :  { %v189_v63 = vand.u32 4294901760, %v188_v36  ;;  %v215_v39 = vand.u32 4294901760, %v1516_v26  ;;  %v1547_v45 = vsub.f32 %v1441_v46, %v87_v52  ;;  %v209_v7 = vsub.f32 %v1511_v25, %v208_v62 }
  0x17   :  { %1112 = vmatpush3.bf16.msra.mxu1 %v1404_v35  ;;  %1184 = vmatpush3.bf16.msra.mxu0 %v1404_v35  ;;  %v196_v5 = vand.u32 4294901760, %v195_v55  ;;  %v203_v6 = vand.u32 4294901760, %v202_v59  ;;  %v229_v46 = vand.u32 4294901760, %v1532_v37  ;;  %v1207_v52 = vpack.c.bf16 %v201_v49, %v194_v48 }
  0x18   :  { %1113 = vmatprep.subr.bf16.mxu1 %v1271_v1  ;;  %1185 = vmatprep.subr.bf16.mxu0 %v1271_v1  ;;  %v216_v12 = vsub.f32 %v1516_v26, %v215_v39  ;;  %v236_v14 = vand.u32 4294901760, %v1547_v45  ;;  %v1147_v59 = vpack.c.bf16 %v1400_v34, %v1395_v32  ;;  %v1153_v32 = vpack.c.bf16 %v1454_v51, %v1452_v50 }
  0x1a   :  { %v217_v17 = vand.u32 4294901760, %v216_v12 }
  0x1b   :  { %1115 = vmatpush3.bf16.msra.mxu1 %v1435_v44  ;;  %1187 = vmatpush3.bf16.msra.mxu0 %v1435_v44 }
  0x1c   :  { %1116 = vmatprep.subr.bf16.mxu1 %v1271_v1  ;;  %1188 = vmatprep.subr.bf16.mxu0 %v1271_v1 }
  0x1f   :  { %1118 = vmatpush3.bf16.msra.mxu1 %v1466_v56  ;;  %1190 = vmatpush3.bf16.msra.mxu0 %v1466_v56 }
  0x20   :  { %1119 = vmatprep.subr.bf16.mxu1 %v1271_v1  ;;  %1191 = vmatprep.subr.bf16.mxu0 %v1271_v1 }
  0x23   :  { %1121 = vmatpush3.bf16.msra.mxu1 %v1487_v4  ;;  %1193 = vmatpush3.bf16.msra.mxu0 %v1487_v4 }
  0x24   :  { %1122 = vmatprep.subr.bf16.mxu1 %v1271_v1  ;;  %1194 = vmatprep.subr.bf16.mxu0 %v1271_v1 }
  0x26   :  { %921 = vmatmul.mubr.f32.vlgmr.msra.gmra.mrb[0].mxu1 %v129_v13  ;;  %1026 = vmatmul.mubr.f32.vlgmr.msra.gmra.mrb[0].mxu0 %v127_v54  ;;  %v1201_v54 = vpack.c.bf16 %v173_v3, %v166_v2  ;;  %v1552_v2 = vsub.f32 %v1446_v47, %v90_v53  ;;  %v1204_v3 = vpack.c.bf16 %v187_v24, %v180_v23  ;;  %v222_v13 = vand.u32 4294901760, %v1527_v31 }
  0x27   :  { %1124 = vmatpush3.bf16.msra.mxu1 %v1123_v20  ;;  %1196 = vmatpush3.bf16.msra.mxu0 %v1195_v11  ;;  %v1132_v11 = vpack.c.bf16 %v189_v63, %v182_v42  ;;  %v1135_v47 = vpack.c.bf16 %v203_v6, %v196_v5  ;;  %v210_v53 = vand.u32 4294901760, %v209_v7  ;;  %v230_v20 = vsub.f32 %v1532_v37, %v229_v46 }
  0x28   :  { %1125 = vmatprep.subr.bf16.mxu1 %v1271_v1  ;;  %1197 = vmatprep.subr.bf16.mxu0 %v1271_v1  ;;  %v223_v18 = vsub.f32 %v1527_v31, %v222_v13  ;;  %v243_v21 = vand.u32 4294901760, %v1552_v2  ;;  %v1210_v23 = vpack.c.bf16 %v215_v39, %v208_v62  ;;  %v237_v24 = vsub.f32 %v1547_v45, %v236_v14 }
  0x29   :  { %955 = vmatprep.mubr.msk.f32.mxu1 %vm1272_vm1, %v1273_v9  ;;  %1060 = vmatprep.mubr.msk.f32.mxu0 %vm1272_vm1, %v1273_v9  ;;  %v231_v48 = vand.u32 4294901760, %v230_v20  ;;  %v1213_v58 = vpack.c.bf16 %v229_v46, %v222_v13  ;;  %v1150_v62 = vpack.c.bf16 %v1422_v41, %v1420_v40  ;;  %v1168_v34 = vpack.c.bf16 %v1552_v2, %v1547_v45 }
  0x2a   :  { %v224_v29 = vand.u32 4294901760, %v223_v18  ;;  %v244_v49 = vsub.f32 %v1552_v2, %v243_v21  ;;  %v238_v30 = vand.u32 4294901760, %v237_v24  ;;  %v1216_v55 = vpack.c.bf16 %v243_v21, %v236_v14 }
  0x2b   :  { %1127 = vmatpush3.bf16.msra.mxu1 %v1126_v57  ;;  %1199 = vmatpush3.bf16.msra.mxu0 %v1198_v28  ;;  %v1138_v28 = vpack.c.bf16 %v217_v17, %v210_v53 }
  0x2c   :  { %1128 = vmatprep.subr.bf16.mxu1 %v1271_v1  ;;  %1200 = vmatprep.subr.bf16.mxu0 %v1271_v1  ;;  %v1141_v57 = vpack.c.bf16 %v231_v48, %v224_v29  ;;  %v245_v36 = vand.u32 4294901760, %v244_v49 }
  0x2f   :  { %1130 = vmatpush3.bf16.msra.mxu1 %v1129_v38  ;;  %1202 = vmatpush3.bf16.msra.mxu0 %v1201_v54  ;;  %v1144_v54 = vpack.c.bf16 %v245_v36, %v238_v30 }
  0x30   :  { %1131 = vmatprep.subr.bf16.mxu1 %v1271_v1  ;;  %1203 = vmatprep.subr.bf16.mxu0 %v1271_v1 }
  0x33   :  { %1133 = vmatpush3.bf16.msra.mxu1 %v1132_v11  ;;  %1205 = vmatpush3.bf16.msra.mxu0 %v1204_v3 }
  0x34   :  { %1134 = vmatprep.subr.bf16.mxu1 %v1271_v1  ;;  %1206 = vmatprep.subr.bf16.mxu0 %v1271_v1 }
  0x37   :  { %1136 = vmatpush3.bf16.msra.mxu1 %v1135_v47  ;;  %1208 = vmatpush3.bf16.msra.mxu0 %v1207_v52 }
  0x38   :  { %1137 = vmatprep.subr.bf16.mxu1 %v1271_v1  ;;  %1209 = vmatprep.subr.bf16.mxu0 %v1271_v1 }
  0x3b   :  { %1139 = vmatpush3.bf16.msra.mxu1 %v1138_v28  ;;  %1211 = vmatpush3.bf16.msra.mxu0 %v1210_v23 }
  0x3c   :  { %1140 = vmatprep.subr.bf16.mxu1 %v1271_v1  ;;  %1212 = vmatprep.subr.bf16.mxu0 %v1271_v1 }
  0x3f   :  { %1142 = vmatpush3.bf16.msra.mxu1 %v1141_v57  ;;  %1214 = vmatpush3.bf16.msra.mxu0 %v1213_v58 }
  0x40   :  { %1143 = vmatprep.subr.bf16.mxu1 %v1271_v1  ;;  %1215 = vmatprep.subr.bf16.mxu0 %v1271_v1 }
  0x43   :  { %1145 = vmatpush3.bf16.msra.mxu1 %v1144_v54  ;;  %1217 = vmatpush3.bf16.msra.mxu0 %v1216_v55 }
  0x44   :  { %1146 = vmatprep.subr.bf16.mxu1 %v1271_v1  ;;  %1218 = vmatprep.subr.bf16.mxu0 %v1271_v1 }
  0x46   :  { %956 = vmatmul.mubr.f32.vlgmr.msra.gmra.mrb[0].mxu1 %v1398_v33  ;;  %1061 = vmatmul.mubr.f32.vlgmr.msra.gmra.mrb[0].mxu0 %v1398_v33 }
  0x47   :  { %1148 = vmatpush3.bf16.msra.mxu1 %v1147_v59  ;;  %1220 = vmatpush3.bf16.msra.mxu0 %v1341_v15  ;;  %v1156_v15 = vpack.c.bf16 %v1475_v61, %v1473_v60 }
  0x48   :  { %1149 = vmatprep.subr.bf16.mxu1 %v1271_v1  ;;  %1221 = vmatprep.subr.bf16.mxu0 %v1271_v1 }
  0x49   :  { %990 = vmatprep.mubr.msk.f32.mxu1 %vm1272_vm1, %v1273_v9  ;;  %1095 = vmatprep.mubr.msk.f32.mxu0 %vm1272_vm1, %v1273_v9 }
  0x4b   :  { %1151 = vmatpush3.bf16.msra.mxu1 %v1150_v62  ;;  %1223 = vmatpush3.bf16.msra.mxu0 %v1345_v16  ;;  %v1159_v16 = vpack.c.bf16 %v1496_v10, %v1493_v8 }
  0x4c   :  { %1152 = vmatprep.subr.bf16.mxu1 %v1271_v1  ;;  %1224 = vmatprep.subr.bf16.mxu0 %v1271_v1 }
  0x4f   :  { %1154 = vmatpush3.bf16.msra.mxu1 %v1153_v32  ;;  %1226 = vmatpush3.bf16.msra.mxu0 %v1363_v22  ;;  %v1162_v22 = vpack.c.bf16 %v1516_v26, %v1511_v25  ;;  %v781_v26 = vld [vmem:[%s1646_s2] ss:$0 sm:$0xff] }
  0x50   :  { %1155 = vmatprep.subr.bf16.mxu1 %v1271_v1  ;;  %1227 = vmatprep.subr.bf16.mxu0 %v1271_v1 }
  0x53   :  { %1157 = vmatpush3.bf16.msra.mxu1 %v1156_v15  ;;  %1229 = vmatpush3.bf16.msra.mxu0 %v1379_v27  ;;  %v1165_v27 = vpack.c.bf16 %v1532_v37, %v1527_v31 }
  0x54   :  { %1158 = vmatprep.subr.bf16.mxu1 %v1271_v1  ;;  %1230 = vmatprep.subr.bf16.mxu0 %v1271_v1 }
  0x57   :  { %1160 = vmatpush3.bf16.msra.mxu1 %v1159_v16  ;;  %1232 = vmatpush3.bf16.msra.mxu0 %v1404_v35  ;;  %v693_v35 = vlaneseq }
  0x58   :  { %1161 = vmatprep.subr.bf16.mxu1 %v1271_v1  ;;  %1233 = vmatprep.subr.bf16.mxu0 %v1271_v1 }
  0x59   :  { %v694_v40 = vand.u32 127, %v693_v35 }
  0x5b   :  { %1163 = vmatpush3.bf16.msra.mxu1 %v1162_v22  ;;  %1235 = vmatpush3.bf16.msra.mxu0 %v1435_v44 }
  0x5c   :  { %1164 = vmatprep.subr.bf16.mxu1 %v1271_v1  ;;  %1236 = vmatprep.subr.bf16.mxu0 %v1271_v1 }
  0x5f   :  { %1166 = vmatpush3.bf16.msra.mxu1 %v1165_v27  ;;  %1238 = vmatpush3.bf16.msra.mxu0 %v1466_v56 }
  0x60   :  { %1167 = vmatprep.subr.bf16.mxu1 %v1271_v1  ;;  %1239 = vmatprep.subr.bf16.mxu0 %v1271_v1 }
  0x63   :  { %1169 = vmatpush3.bf16.msra.mxu1 %v1168_v34  ;;  %1241 = vmatpush3.bf16.msra.mxu0 %v1487_v4 }
  0x66   :  { %991 = vmatmul.mubr.f32.vlgmr.msra.gmra.mrb[0].mxu1 %v1427_v43  ;;  %1096 = vmatmul.mubr.f32.vlgmr.msra.gmra.mrb[0].mxu0 %v1398_v33 }
  0x84   :  { %v697_v37 = vpop.permute.xlu1 %696 }
  0x85   :  { %vm698_vm3 = vcmp.eq.s32.totalorder %v694_v40, %v697_v37 }
  0x90   :  { %v734_v41 = vpop.xlane.xlu0 %733 }
  0x91   :  { %vm747_vm2 = vcmp.eq.f32.partialorder %v1313_v0, %v734_v41  ;;  %v735_v25 = vsub.f32 %v1313_v0, %v734_v41 }
  0x92   :  { %v748_v44 = vsel %vm747_vm2, %v694_v40, 2 }
  0x93   :  { %v749_v50 = vsel %vm731_vm0, %v748_v44, 2147483647  ;;  %v736_v42 = vmul.f32 1.442695, %v735_v25 }
  0x94   :  { %v751_v51 = vshra.s32 %v749_v50, 16  ;;  %v750_v5 = vand.u32 65535, %v749_v50 }
  0x96   :  { %v753_v56 = vcvt.s32.f32 %v751_v51  ;;  %v752_v6 = vcvt.s32.f32 %v750_v5 }
  0x98   :  { %754 = vmin.xlane.f32.xlu1 %v753_v56 }
  0x9e   :  { %v25_v60 = vpop.xlane.xlu0 %24 }
  0x9f   :  { %v26_v1 = vmax.f32 %v25_v60, 9.999999e-19 }
  0xa1   :  { %1257 = vrsqrt.f32 %v26_v1 }
  0xab   :  { %v1258_v61 = vpop.eup %1257 }
 0x125   :  { %v755_v3 = vpop.xlane.xlu1 %754 }
 0x126   :  { %vm756_vm4 = vcmp.eq.f32.partialorder %v753_v56, %v755_v3  ;;  %v761_v21 = vcvt.f32.s32 %v755_v3 }
 0x127   :  { %v757_v7 = vsel %vm756_vm4, %v752_v6, inf }
 0x128   :  { %v762_v29 = vshll.u32 %v761_v21, 16 }
 0x139   :  { %v386_v4 = vpop.f32.mrb[0].mxu1  ;;  %v681_v8 = vpop.f32.mrb[0].mxu0 }
 0x13a   :  { %v1242_v43 = vadd.f32 %v681_v8, %v386_v4  ;;  %v992_v10 = vpop.f32.mrb[1].mxu1  ;;  %v1097_v33 = vpop.f32.mrb[1].mxu0 }
 0x13c   :  { %v685_v31 = vmul.f32 %v1258_v61, %v1242_v43 }
 0x13e   :  { %v692_v38 = vmul.f32 %v781_v26, %v685_v31 }
 0x140   :  { %v699_v63 = vsel %vm698_vm3, %v692_v38, 0.0  ;;  %v707_v39 = vmul.f32 1.442695, %v692_v38 }
 0x141   :  { %700 = vadd.xlane.f32.xlu0 %v699_v63 }
 0x142   :  { %1259 = vpow2.f32 %v707_v39 }
 0x143   :  { %1261 = vpow2.f32 %v736_v42 }
 0x14c   :  { %v1260_v45 = vpop.eup %1259 }
 0x14d   :  { %v1262_v2 = vpop.eup %1261  ;;  %711 = vadd.xlane.f32.xlu0 %v1260_v45 }
 0x14e   :  { %v738_v0 = vsel %vm731_vm0, %v1262_v2, 0.0 }
 0x151   :  { %739 = vadd.xlane.f32.xlu0 %v738_v0 }
 0x155   :  { %758 = vmin.xlane.f32.xlu0 %v757_v7 }
 0x1ce   :  { %v701_v11 = vpop.xlane.xlu0 %700 }
 0x1cf   :  { %v782_v12 = vclamps-f32 %v701_v11, 1.0 }
 0x1d1   :  { %v704_v13 = vmul.f32 2.0, %v782_v12  ;;  %v709_v46 = vmul.f32 1.442695, %v782_v12 }
 0x1d3   :  { %v705_v47 = vmul.f32 %v782_v12, %v704_v13  ;;  %1263 = vpow2.f32 %v709_v46 }
 0x1d5   :  { %v783_v52 = vadd.f32 -1.0, %v705_v47 }
 0x1d7   :  { %v715_v53 = vmul.f32 1.442695, %v783_v52 }
 0x1d9   :  { %1265 = vpow2.f32 %v715_v53 }
 0x1da   :  { %v712_v14 = vpop.xlane.xlu0 %711 }
 0x1dd   :  { %v1264_v17 = vpop.eup %1263 }
 0x1de   :  { %v713_v18 = vsub.f32 %v712_v14, %v1264_v17  ;;  %v740_v20 = vpop.xlane.xlu0 %739 }
 0x1df   :  { %1267 = vrcp.f32 %v740_v20 }
 0x1e0   :  { %v784_v23 = vadd.f32 -112.0, %v713_v18 }
 0x1e2   :  { %v759_v24 = vpop.xlane.xlu0 %758 }
 0x1e3   :  { %v1266_v28 = vpop.eup %1265  ;;  %v760_v48 = vcvt.f32.s32 %v759_v24 }
 0x1e4   :  { %v717_v49 = vadd.f32 %v1266_v28, %v784_v23 }
 0x1e5   :  { %v763_v57 = vadd.s32 %v762_v29, %v760_v48 }
 0x1e6   :  { %v718_v58 = vmax.f32 %v717_v49, 1e-09 }
 0x1e7   :  { %vm764_vm6 = vcmp.eq.s32.totalorder %v763_v57, %v1350_v19 }
 0x1e8   :  { %1269 = vlog2.f32 %v718_v58  ;;  %v785_v30 = vsel %vm764_vm6, 1.0, %v1273_v9 }
 0x1e9   :  { %v1268_v36 = vpop.eup %1267  ;;  %768 = vst.msk [vmem:[%s1647_s6] sm:$0xff] %vm729_vm5, %v785_v30 }
 0x1ea   :  { %v742_v54 = vmul.f32 %v1268_v36, %v740_v20 }
 0x1ec   :  { %v743_v55 = vsub.f32 2.0, %v742_v54 }
 0x1ee   :  { %v744_v59 = vmul.f32 %v1268_v36, %v743_v55 }
 0x1f0   :  { %v745_v62 = vmul.f32 %v1262_v2, %v744_v59 }
 0x1f2   :  { %v1270_v32 = vpop.eup %1269  ;;  %746 = vst.msk [vmem:[%s1648_s4] sm:$0xff] %vm731_vm0, %v745_v62 }
 0x1f3   :  { %v720_v19 = vmul.f32 0.6931472, %v1270_v32 }
 0x1f5   :  { %v721_v15 = vsub.f32 %v783_v52, %v720_v19 }
 0x1f7   :  { %730 = vst.msk [vmem:[%s1649_s5] sm:$0xff] %vm729_vm5, %v721_v15 }

// kernel: angular_softmax.1
= control target key start
LH: loop header
LB: loop body
LE: loop exit
PB: predicated region body
PF: predicated region fallthrough
CT: control target
= control target key end

     0   :  { %vm731_vm0 = vcmask 15360   ;;  %v1271_v1 = vmov 0.0|0.0   ;;  %vm1272_vm1 = vmmov 0   ;;  %v1273_v9 = vmov 0.0   ;;  %s1643_s0 = inlined_call_operand.vmem [shape: f32[8,128], index: 0, kind: input, shape index: {}]   ;;  %s1644_s3 = inlined_call_operand.vmem [shape: f32[128,128], index: 3, kind: input, shape index: {}]   ;;  %s1645_s1 = inlined_call_operand.vmem [shape: s32[8,1], index: 1, kind: input, shape index: {}]   ;;  %s1646_s2 = inlined_call_operand.vmem [shape: f32[1,128], index: 2, kind: input, shape index: {}]   ;;  %s1647_s6 = inlined_call_operand.vmem [shape: f32[8,1], index: 6, kind: output, shape index: {2}]   ;;  %s1648_s4 = inlined_call_operand.vmem [shape: f32[8,2], index: 4, kind: output, shape index: {0}]   ;;  %s1649_s5 = inlined_call_operand.vmem [shape: f32[8,1], index: 5, kind: output, shape index: {1}]  }
   0x1   :  { %v1313_v0 = vld [vmem:[%s1643_s0] sm:$0xff]  ;;  %1098 = vmatprep.subr.bf16.mxu1 %v1271_v1  ;;  %1170 = vmatprep.subr.bf16.mxu0 %v1271_v1  ;;  %v29_v3 = vld [vmem:[%s1644_s3 + $0x8] sm:$0xff]  ;;  %v30_v7 = vld [vmem:[%s1644_s3 + $0x10] sm:$0xff]  ;;  %v1274_v14 = vmov 0   ;;  %vm729_vm5 = vcmask 7168  }
   0x2   :  { %v28_v2 = vld [vmem:[%s1644_s3] sm:$0xff]  ;;  %v732_v4 = vsel %vm731_vm0, %v1313_v0, -inf  ;;  %v48_v6 = vand.u32 4294901760, %v29_v3  ;;  %v31_v8 = vld [vmem:[%s1644_s3 + $0x18] sm:$0xff]  ;;  %920 = vmatprep.mubr.msk.f32.mxu1 %vm1272_vm1, %v1273_v9  ;;  %1025 = vmatprep.mubr.msk.f32.mxu0 %vm1272_vm1, %v1273_v9  ;;  %v51_v10 = vand.u32 4294901760, %v30_v7  ;;  %v33_v13 = vld [vmem:[%s1644_s3 + $0x28] sm:$0xff] }
   0x3   :  { %v45_v5 = vand.u32 4294901760, %v28_v2  ;;  %733 = vmax.xlane.f32.xlu0 %v732_v4  ;;  %v54_v11 = vand.u32 4294901760, %v31_v8  ;;  %v32_v12 = vld [vmem:[%s1644_s3 + $0x20] sm:$0xff]  ;;  %1255 = vset.pattern.permute.xlu1 %v1274_v14  ;;  %v60_v18 = vand.u32 4294901760, %v33_v13  ;;  %v34_v20 = vld [vmem:[%s1644_s3 + $0x30] sm:$0xff]  ;;  %v35_v21 = vld [vmem:[%s1644_s3 + $0x38] sm:$0xff] }
   0x4   :  { %1256 = vset.pattern.permute.xlu0 %v1274_v14  ;;  %v57_v17 = vand.u32 4294901760, %v32_v12  ;;  %v1350_v19 = vld [vmem:[%s1645_s1] sm:$0xff]  ;;  %v63_v23 = vand.u32 4294901760, %v34_v20  ;;  %v66_v24 = vand.u32 4294901760, %v35_v21  ;;  %v1375_v26 = vld [vmem:[%s1644_s3 + $0x48] sm:$0xff]  ;;  %v1388_v30 = vld [vmem:[%s1644_s3 + $0x50] sm:$0xff]  ;;  %v1400_v34 = vsub.f32 %v29_v3, %v48_v6 }
   0x5   :  { %v1341_v15 = vpack.c.bf16 %v48_v6, %v45_v5  ;;  %v1345_v16 = vpack.c.bf16 %v54_v11, %v51_v10  ;;  %696 = vperm.xlu1 %1255, %v1350_v19   ;;  %v1370_v25 = vld [vmem:[%s1644_s3 + $0x40] sm:$0xff]  ;;  %v72_v29 = vand.u32 4294901760, %v1375_v26  ;;  %v1393_v31 = vld [vmem:[%s1644_s3 + $0x58] sm:$0xff]  ;;  %v1395_v32 = vsub.f32 %v28_v2, %v45_v5  ;;  %v1418_v39 = vld [vmem:[%s1644_s3 + $0x68] sm:$0xff] }
   0x6   :  { %v1363_v22 = vpack.c.bf16 %v60_v18, %v57_v17  ;;  %v1379_v27 = vpack.c.bf16 %v66_v24, %v63_v23  ;;  %v69_v28 = vand.u32 4294901760, %v1370_v25  ;;  %v1398_v33 = vand.u32 4294901760, %v1313_v0  ;;  %v1411_v38 = vld [vmem:[%s1644_s3 + $0x60] sm:$0xff]  ;;  %v1441_v46 = vld [vmem:[%s1644_s3 + $0x70] sm:$0xff]  ;;  %v1446_v47 = vld [vmem:[%s1644_s3 + $0x78] sm:$0xff] }
   0x7   :  { %1100 = vmatpush3.bf16.msra.mxu1 %v1341_v15  ;;  %1172 = vmatpush3.bf16.msra.mxu0 %v1341_v15  ;;  %v75_v36 = vand.u32 4294901760, %v1388_v30  ;;  %v78_v37 = vand.u32 4294901760, %v1393_v31  ;;  %v1420_v40 = vsub.f32 %v30_v7, %v51_v10  ;;  %v1422_v41 = vsub.f32 %v31_v8, %v54_v11 }
   0x8   :  { %1101 = vmatprep.subr.bf16.mxu1 %v1271_v1  ;;  %1173 = vmatprep.subr.bf16.mxu0 %v1271_v1  ;;  %v1404_v35 = vpack.c.bf16 %v72_v29, %v69_v28  ;;  %v81_v42 = vand.u32 4294901760, %v1411_v38  ;;  %v1427_v43 = vsub.f32 %v1313_v0, %v1398_v33  ;;  %v84_v45 = vand.u32 4294901760, %v1418_v39 }
   0x9   :  { %v1435_v44 = vpack.c.bf16 %v78_v37, %v75_v36  ;;  %v138_v48 = vand.u32 4294901760, %v1395_v32  ;;  %v145_v49 = vand.u32 4294901760, %v1400_v34  ;;  %v1452_v50 = vsub.f32 %v32_v12, %v57_v17 }
   0xa   :  { %v1454_v51 = vsub.f32 %v33_v13, %v60_v18  ;;  %v87_v52 = vand.u32 4294901760, %v1441_v46  ;;  %v90_v53 = vand.u32 4294901760, %v1446_v47  ;;  %v127_v54 = vand.u32 4294901760, %v1427_v43 }
   0xb   :  { %1103 = vmatpush3.bf16.msra.mxu1 %v1345_v16  ;;  %1175 = vmatpush3.bf16.msra.mxu0 %v1345_v16  ;;  %v152_v55 = vand.u32 4294901760, %v1420_v40  ;;  %v1466_v56 = vpack.c.bf16 %v84_v45, %v81_v42  ;;  %v139_v57 = vsub.f32 %v1395_v32, %v138_v48  ;;  %v146_v58 = vsub.f32 %v1400_v34, %v145_v49 }
   0xc   :  { %1104 = vmatprep.subr.bf16.mxu1 %v1271_v1  ;;  %1176 = vmatprep.subr.bf16.mxu0 %v1271_v1  ;;  %v159_v59 = vand.u32 4294901760, %v1422_v41  ;;  %v1473_v60 = vsub.f32 %v34_v20, %v63_v23  ;;  %v1475_v61 = vsub.f32 %v35_v21, %v66_v24  ;;  %v128_v62 = vsub.f32 %v1427_v43, %v127_v54 }
   0xd   :  { %v153_v63 = vsub.f32 %v1420_v40, %v152_v55  ;;  %v166_v2 = vand.u32 4294901760, %v1452_v50  ;;  %v173_v3 = vand.u32 4294901760, %v1454_v51  ;;  %v1487_v4 = vpack.c.bf16 %v90_v53, %v87_v52 }
   0xe   :  { %v140_v5 = vand.u32 4294901760, %v139_v57  ;;  %v147_v6 = vand.u32 4294901760, %v146_v58  ;;  %v160_v7 = vsub.f32 %v1422_v41, %v159_v59  ;;  %v1493_v8 = vsub.f32 %v1370_v25, %v69_v28 }
   0xf   :  { %1106 = vmatpush3.bf16.msra.mxu1 %v1363_v22  ;;  %1178 = vmatpush3.bf16.msra.mxu0 %v1363_v22  ;;  %v1496_v10 = vsub.f32 %v1375_v26, %v72_v29  ;;  %v1195_v11 = vpack.c.bf16 %v145_v49, %v138_v48  ;;  %v23_v12 = vmul.f32 %v1313_v0, %v1313_v0  ;;  %v129_v13 = vand.u32 4294901760, %v128_v62 }
  0x10   :  { %1107 = vmatprep.subr.bf16.mxu1 %v1271_v1  ;;  %1179 = vmatprep.subr.bf16.mxu0 %v1271_v1  ;;  %v154_v14 = vand.u32 4294901760, %v153_v63  ;;  %v167_v17 = vsub.f32 %v1452_v50, %v166_v2  ;;  %v174_v18 = vsub.f32 %v1454_v51, %v173_v3  ;;  %v1123_v20 = vpack.c.bf16 %v147_v6, %v140_v5 }
  0x11   :  { %v161_v21 = vand.u32 4294901760, %v160_v7  ;;  %v180_v23 = vand.u32 4294901760, %v1473_v60  ;;  %v187_v24 = vand.u32 4294901760, %v1475_v61  ;;  %v1511_v25 = vsub.f32 %v1388_v30, %v75_v36  ;;  %24 = vadd.xlane.f32.xlu0 %v23_v12 }
  0x12   :  { %v1516_v26 = vsub.f32 %v1393_v31, %v78_v37  ;;  %v1198_v28 = vpack.c.bf16 %v159_v59, %v152_v55  ;;  %v168_v29 = vand.u32 4294901760, %v167_v17  ;;  %v194_v48 = vand.u32 4294901760, %v1493_v8 }
  0x13   :  { %1109 = vmatpush3.bf16.msra.mxu1 %v1379_v27  ;;  %1181 = vmatpush3.bf16.msra.mxu0 %v1379_v27  ;;  %v201_v49 = vand.u32 4294901760, %v1496_v10  ;;  %v1126_v57 = vpack.c.bf16 %v161_v21, %v154_v14  ;;  %v175_v58 = vand.u32 4294901760, %v174_v18  ;;  %v181_v30 = vsub.f32 %v1473_v60, %v180_v23 }
  0x14   :  { %1110 = vmatprep.subr.bf16.mxu1 %v1271_v1  ;;  %1182 = vmatprep.subr.bf16.mxu0 %v1271_v1  ;;  %v188_v36 = vsub.f32 %v1475_v61, %v187_v24  ;;  %v1527_v31 = vsub.f32 %v1411_v38, %v81_v42  ;;  %v1532_v37 = vsub.f32 %v1418_v39, %v84_v45  ;;  %v208_v62 = vand.u32 4294901760, %v1511_v25 }
  0x15   :  { %v195_v55 = vsub.f32 %v1493_v8, %v194_v48  ;;  %v202_v59 = vsub.f32 %v1496_v10, %v201_v49  ;;  %v1129_v38 = vpack.c.bf16 %v175_v58, %v168_v29  ;;  %v182_v42 = vand.u32 4294901760, %v181_v30 }
  0x16   :  { %v189_v63 = vand.u32 4294901760, %v188_v36  ;;  %v215_v39 = vand.u32 4294901760, %v1516_v26  ;;  %v1547_v45 = vsub.f32 %v1441_v46, %v87_v52  ;;  %v209_v7 = vsub.f32 %v1511_v25, %v208_v62 }
  0x17   :  { %1112 = vmatpush3.bf16.msra.mxu1 %v1404_v35  ;;  %1184 = vmatpush3.bf16.msra.mxu0 %v1404_v35  ;;  %v196_v5 = vand.u32 4294901760, %v195_v55  ;;  %v203_v6 = vand.u32 4294901760, %v202_v59  ;;  %v229_v46 = vand.u32 4294901760, %v1532_v37  ;;  %v1207_v52 = vpack.c.bf16 %v201_v49, %v194_v48 }
  0x18   :  { %1113 = vmatprep.subr.bf16.mxu1 %v1271_v1  ;;  %1185 = vmatprep.subr.bf16.mxu0 %v1271_v1  ;;  %v216_v12 = vsub.f32 %v1516_v26, %v215_v39  ;;  %v236_v14 = vand.u32 4294901760, %v1547_v45  ;;  %v1147_v59 = vpack.c.bf16 %v1400_v34, %v1395_v32  ;;  %v1153_v32 = vpack.c.bf16 %v1454_v51, %v1452_v50 }
  0x1a   :  { %v217_v17 = vand.u32 4294901760, %v216_v12 }
  0x1b   :  { %1115 = vmatpush3.bf16.msra.mxu1 %v1435_v44  ;;  %1187 = vmatpush3.bf16.msra.mxu0 %v1435_v44 }
  0x1c   :  { %1116 = vmatprep.subr.bf16.mxu1 %v1271_v1  ;;  %1188 = vmatprep.subr.bf16.mxu0 %v1271_v1 }
  0x1f   :  { %1118 = vmatpush3.bf16.msra.mxu1 %v1466_v56  ;;  %1190 = vmatpush3.bf16.msra.mxu0 %v1466_v56 }
  0x20   :  { %1119 = vmatprep.subr.bf16.mxu1 %v1271_v1  ;;  %1191 = vmatprep.subr.bf16.mxu0 %v1271_v1 }
  0x23   :  { %1121 = vmatpush3.bf16.msra.mxu1 %v1487_v4  ;;  %1193 = vmatpush3.bf16.msra.mxu0 %v1487_v4 }
  0x24   :  { %1122 = vmatprep.subr.bf16.mxu1 %v1271_v1  ;;  %1194 = vmatprep.subr.bf16.mxu0 %v1271_v1 }
  0x26   :  { %921 = vmatmul.mubr.f32.vlgmr.msra.gmra.mrb[0].mxu1 %v129_v13  ;;  %1026 = vmatmul.mubr.f32.vlgmr.msra.gmra.mrb[0].mxu0 %v127_v54  ;;  %v1201_v54 = vpack.c.bf16 %v173_v3, %v166_v2  ;;  %v1552_v2 = vsub.f32 %v1446_v47, %v90_v53  ;;  %v1204_v3 = vpack.c.bf16 %v187_v24, %v180_v23  ;;  %v222_v13 = vand.u32 4294901760, %v1527_v31 }
  0x27   :  { %1124 = vmatpush3.bf16.msra.mxu1 %v1123_v20  ;;  %1196 = vmatpush3.bf16.msra.mxu0 %v1195_v11  ;;  %v1132_v11 = vpack.c.bf16 %v189_v63, %v182_v42  ;;  %v1135_v47 = vpack.c.bf16 %v203_v6, %v196_v5  ;;  %v210_v53 = vand.u32 4294901760, %v209_v7  ;;  %v230_v20 = vsub.f32 %v1532_v37, %v229_v46 }
  0x28   :  { %1125 = vmatprep.subr.bf16.mxu1 %v1271_v1  ;;  %1197 = vmatprep.subr.bf16.mxu0 %v1271_v1  ;;  %v223_v18 = vsub.f32 %v1527_v31, %v222_v13  ;;  %v243_v21 = vand.u32 4294901760, %v1552_v2  ;;  %v1210_v23 = vpack.c.bf16 %v215_v39, %v208_v62  ;;  %v237_v24 = vsub.f32 %v1547_v45, %v236_v14 }
  0x29   :  { %955 = vmatprep.mubr.msk.f32.mxu1 %vm1272_vm1, %v1273_v9  ;;  %1060 = vmatprep.mubr.msk.f32.mxu0 %vm1272_vm1, %v1273_v9  ;;  %v231_v48 = vand.u32 4294901760, %v230_v20  ;;  %v1213_v58 = vpack.c.bf16 %v229_v46, %v222_v13  ;;  %v1150_v62 = vpack.c.bf16 %v1422_v41, %v1420_v40  ;;  %v1168_v34 = vpack.c.bf16 %v1552_v2, %v1547_v45 }
  0x2a   :  { %v224_v29 = vand.u32 4294901760, %v223_v18  ;;  %v244_v49 = vsub.f32 %v1552_v2, %v243_v21  ;;  %v238_v30 = vand.u32 4294901760, %v237_v24  ;;  %v1216_v55 = vpack.c.bf16 %v243_v21, %v236_v14 }
  0x2b   :  { %1127 = vmatpush3.bf16.msra.mxu1 %v1126_v57  ;;  %1199 = vmatpush3.bf16.msra.mxu0 %v1198_v28  ;;  %v1138_v28 = vpack.c.bf16 %v217_v17, %v210_v53 }
  0x2c   :  { %1128 = vmatprep.subr.bf16.mxu1 %v1271_v1  ;;  %1200 = vmatprep.subr.bf16.mxu0 %v1271_v1  ;;  %v1141_v57 = vpack.c.bf16 %v231_v48, %v224_v29  ;;  %v245_v36 = vand.u32 4294901760, %v244_v49 }
  0x2f   :  { %1130 = vmatpush3.bf16.msra.mxu1 %v1129_v38  ;;  %1202 = vmatpush3.bf16.msra.mxu0 %v1201_v54  ;;  %v1144_v54 = vpack.c.bf16 %v245_v36, %v238_v30 }
  0x30   :  { %1131 = vmatprep.subr.bf16.mxu1 %v1271_v1  ;;  %1203 = vmatprep.subr.bf16.mxu0 %v1271_v1 }
  0x33   :  { %1133 = vmatpush3.bf16.msra.mxu1 %v1132_v11  ;;  %1205 = vmatpush3.bf16.msra.mxu0 %v1204_v3 }
  0x34   :  { %1134 = vmatprep.subr.bf16.mxu1 %v1271_v1  ;;  %1206 = vmatprep.subr.bf16.mxu0 %v1271_v1 }
  0x37   :  { %1136 = vmatpush3.bf16.msra.mxu1 %v1135_v47  ;;  %1208 = vmatpush3.bf16.msra.mxu0 %v1207_v52 }
  0x38   :  { %1137 = vmatprep.subr.bf16.mxu1 %v1271_v1  ;;  %1209 = vmatprep.subr.bf16.mxu0 %v1271_v1 }
  0x3b   :  { %1139 = vmatpush3.bf16.msra.mxu1 %v1138_v28  ;;  %1211 = vmatpush3.bf16.msra.mxu0 %v1210_v23 }
  0x3c   :  { %1140 = vmatprep.subr.bf16.mxu1 %v1271_v1  ;;  %1212 = vmatprep.subr.bf16.mxu0 %v1271_v1 }
  0x3f   :  { %1142 = vmatpush3.bf16.msra.mxu1 %v1141_v57  ;;  %1214 = vmatpush3.bf16.msra.mxu0 %v1213_v58 }
  0x40   :  { %1143 = vmatprep.subr.bf16.mxu1 %v1271_v1  ;;  %1215 = vmatprep.subr.bf16.mxu0 %v1271_v1 }
  0x43   :  { %1145 = vmatpush3.bf16.msra.mxu1 %v1144_v54  ;;  %1217 = vmatpush3.bf16.msra.mxu0 %v1216_v55 }
  0x44   :  { %1146 = vmatprep.subr.bf16.mxu1 %v1271_v1  ;;  %1218 = vmatprep.subr.bf16.mxu0 %v1271_v1 }
  0x46   :  { %956 = vmatmul.mubr.f32.vlgmr.msra.gmra.mrb[0].mxu1 %v1398_v33  ;;  %1061 = vmatmul.mubr.f32.vlgmr.msra.gmra.mrb[0].mxu0 %v1398_v33 }
  0x47   :  { %1148 = vmatpush3.bf16.msra.mxu1 %v1147_v59  ;;  %1220 = vmatpush3.bf16.msra.mxu0 %v1341_v15  ;;  %v1156_v15 = vpack.c.bf16 %v1475_v61, %v1473_v60 }
  0x48   :  { %1149 = vmatprep.subr.bf16.mxu1 %v1271_v1  ;;  %1221 = vmatprep.subr.bf16.mxu0 %v1271_v1 }
  0x49   :  { %990 = vmatprep.mubr.msk.f32.mxu1 %vm1272_vm1, %v1273_v9  ;;  %1095 = vmatprep.mubr.msk.f32.mxu0 %vm1272_vm1, %v1273_v9 }
  0x4b   :  { %1151 = vmatpush3.bf16.msra.mxu1 %v1150_v62  ;;  %1223 = vmatpush3.bf16.msra.mxu0 %v1345_v16  ;;  %v1159_v16 = vpack.c.bf16 %v1496_v10, %v1493_v8 }
  0x4c   :  { %1152 = vmatprep.subr.bf16.mxu1 %v1271_v1  ;;  %1224 = vmatprep.subr.bf16.mxu0 %v1271_v1 }
  0x4f   :  { %1154 = vmatpush3.bf16.msra.mxu1 %v1153_v32  ;;  %1226 = vmatpush3.bf16.msra.mxu0 %v1363_v22  ;;  %v1162_v22 = vpack.c.bf16 %v1516_v26, %v1511_v25  ;;  %v781_v26 = vld [vmem:[%s1646_s2] ss:$0 sm:$0xff] }
  0x50   :  { %1155 = vmatprep.subr.bf16.mxu1 %v1271_v1  ;;  %1227 = vmatprep.subr.bf16.mxu0 %v1271_v1 }
  0x53   :  { %1157 = vmatpush3.bf16.msra.mxu1 %v1156_v15  ;;  %1229 = vmatpush3.bf16.msra.mxu0 %v1379_v27  ;;  %v1165_v27 = vpack.c.bf16 %v1532_v37, %v1527_v31 }
  0x54   :  { %1158 = vmatprep.subr.bf16.mxu1 %v1271_v1  ;;  %1230 = vmatprep.subr.bf16.mxu0 %v1271_v1 }
  0x57   :  { %1160 = vmatpush3.bf16.msra.mxu1 %v1159_v16  ;;  %1232 = vmatpush3.bf16.msra.mxu0 %v1404_v35  ;;  %v693_v35 = vlaneseq }
  0x58   :  { %1161 = vmatprep.subr.bf16.mxu1 %v1271_v1  ;;  %1233 = vmatprep.subr.bf16.mxu0 %v1271_v1 }
  0x59   :  { %v694_v40 = vand.u32 127, %v693_v35 }
  0x5b   :  { %1163 = vmatpush3.bf16.msra.mxu1 %v1162_v22  ;;  %1235 = vmatpush3.bf16.msra.mxu0 %v1435_v44 }
  0x5c   :  { %1164 = vmatprep.subr.bf16.mxu1 %v1271_v1  ;;  %1236 = vmatprep.subr.bf16.mxu0 %v1271_v1 }
  0x5f   :  { %1166 = vmatpush3.bf16.msra.mxu1 %v1165_v27  ;;  %1238 = vmatpush3.bf16.msra.mxu0 %v1466_v56 }
  0x60   :  { %1167 = vmatprep.subr.bf16.mxu1 %v1271_v1  ;;  %1239 = vmatprep.subr.bf16.mxu0 %v1271_v1 }
  0x63   :  { %1169 = vmatpush3.bf16.msra.mxu1 %v1168_v34  ;;  %1241 = vmatpush3.bf16.msra.mxu0 %v1487_v4 }
  0x66   :  { %991 = vmatmul.mubr.f32.vlgmr.msra.gmra.mrb[0].mxu1 %v1427_v43  ;;  %1096 = vmatmul.mubr.f32.vlgmr.msra.gmra.mrb[0].mxu0 %v1398_v33 }
  0x84   :  { %v697_v37 = vpop.permute.xlu1 %696 }
  0x85   :  { %vm698_vm3 = vcmp.eq.s32.totalorder %v694_v40, %v697_v37 }
  0x90   :  { %v734_v41 = vpop.xlane.xlu0 %733 }
  0x91   :  { %vm747_vm2 = vcmp.eq.f32.partialorder %v1313_v0, %v734_v41  ;;  %v735_v25 = vsub.f32 %v1313_v0, %v734_v41 }
  0x92   :  { %v748_v44 = vsel %vm747_vm2, %v694_v40, 2 }
  0x93   :  { %v749_v50 = vsel %vm731_vm0, %v748_v44, 2147483647  ;;  %v736_v42 = vmul.f32 1.442695, %v735_v25 }
  0x94   :  { %v751_v51 = vshra.s32 %v749_v50, 16  ;;  %v750_v5 = vand.u32 65535, %v749_v50 }
  0x96   :  { %v753_v56 = vcvt.s32.f32 %v751_v51  ;;  %v752_v6 = vcvt.s32.f32 %v750_v5 }
  0x98   :  { %754 = vmin.xlane.f32.xlu1 %v753_v56 }
  0x9e   :  { %v25_v60 = vpop.xlane.xlu0 %24 }
  0x9f   :  { %v26_v1 = vmax.f32 %v25_v60, 9.999999e-19 }
  0xa1   :  { %1257 = vrsqrt.f32 %v26_v1 }
  0xab   :  { %v1258_v61 = vpop.eup %1257 }
 0x125   :  { %v755_v3 = vpop.xlane.xlu1 %754 }
 0x126   :  { %vm756_vm4 = vcmp.eq.f32.partialorder %v753_v56, %v755_v3  ;;  %v761_v21 = vcvt.f32.s32 %v755_v3 }
 0x127   :  { %v757_v7 = vsel %vm756_vm4, %v752_v6, inf }
 0x128   :  { %v762_v29 = vshll.u32 %v761_v21, 16 }
 0x139   :  { %v386_v4 = vpop.f32.mrb[0].mxu1  ;;  %v681_v8 = vpop.f32.mrb[0].mxu0 }
 0x13a   :  { %v1242_v43 = vadd.f32 %v681_v8, %v386_v4  ;;  %v992_v10 = vpop.f32.mrb[1].mxu1  ;;  %v1097_v33 = vpop.f32.mrb[1].mxu0 }
 0x13c   :  { %v685_v31 = vmul.f32 %v1258_v61, %v1242_v43 }
 0x13e   :  { %v692_v38 = vmul.f32 %v781_v26, %v685_v31 }
 0x140   :  { %v699_v63 = vsel %vm698_vm3, %v692_v38, 0.0  ;;  %v707_v39 = vmul.f32 1.442695, %v692_v38 }
 0x141   :  { %700 = vadd.xlane.f32.xlu0 %v699_v63 }
 0x142   :  { %1259 = vpow2.f32 %v707_v39 }
 0x143   :  { %1261 = vpow2.f32 %v736_v42 }
 0x14c   :  { %v1260_v45 = vpop.eup %1259 }
 0x14d   :  { %v1262_v2 = vpop.eup %1261  ;;  %711 = vadd.xlane.f32.xlu0 %v1260_v45 }
 0x14e   :  { %v738_v0 = vsel %vm731_vm0, %v1262_v2, 0.0 }
 0x151   :  { %739 = vadd.xlane.f32.xlu0 %v738_v0 }
 0x155   :  { %758 = vmin.xlane.f32.xlu0 %v757_v7 }
 0x1ce   :  { %v701_v11 = vpop.xlane.xlu0 %700 }
 0x1cf   :  { %v782_v12 = vclamps-f32 %v701_v11, 1.0 }
 0x1d1   :  { %v704_v13 = vmul.f32 2.0, %v782_v12  ;;  %v709_v46 = vmul.f32 1.442695, %v782_v12 }
 0x1d3   :  { %v705_v47 = vmul.f32 %v782_v12, %v704_v13  ;;  %1263 = vpow2.f32 %v709_v46 }
 0x1d5   :  { %v783_v52 = vadd.f32 -1.0, %v705_v47 }
 0x1d7   :  { %v715_v53 = vmul.f32 1.442695, %v783_v52 }
 0x1d9   :  { %1265 = vpow2.f32 %v715_v53 }
 0x1da   :  { %v712_v14 = vpop.xlane.xlu0 %711 }
 0x1dd   :  { %v1264_v17 = vpop.eup %1263 }
 0x1de   :  { %v713_v18 = vsub.f32 %v712_v14, %v1264_v17  ;;  %v740_v20 = vpop.xlane.xlu0 %739 }
 0x1df   :  { %1267 = vrcp.f32 %v740_v20 }
 0x1e0   :  { %v784_v23 = vadd.f32 -112.0, %v713_v18 }
 0x1e2   :  { %v759_v24 = vpop.xlane.xlu0 %758 }
 0x1e3   :  { %v1266_v28 = vpop.eup %1265  ;;  %v760_v48 = vcvt.f32.s32 %v759_v24 }
 0x1e4   :  { %v717_v49 = vadd.f32 %v1266_v28, %v784_v23 }
 0x1e5   :  { %v763_v57 = vadd.s32 %v762_v29, %v760_v48 }
 0x1e6   :  { %v718_v58 = vmax.f32 %v717_v49, 1e-09 }
 0x1e7   :  { %vm764_vm6 = vcmp.eq.s32.totalorder %v763_v57, %v1350_v19 }
 0x1e8   :  { %1269 = vlog2.f32 %v718_v58  ;;  %v785_v30 = vsel %vm764_vm6, 1.0, %v1273_v9 }
 0x1e9   :  { %v1268_v36 = vpop.eup %1267  ;;  %768 = vst.msk [vmem:[%s1647_s6] sm:$0xff] %vm729_vm5, %v785_v30 }
 0x1ea   :  { %v742_v54 = vmul.f32 %v1268_v36, %v740_v20 }
 0x1ec   :  { %v743_v55 = vsub.f32 2.0, %v742_v54 }
 0x1ee   :  { %v744_v59 = vmul.f32 %v1268_v36, %v743_v55 }
 0x1f0   :  { %v745_v62 = vmul.f32 %v1262_v2, %v744_v59 }
 0x1f2   :  { %v1270_v32 = vpop.eup %1269  ;;  %746 = vst.msk [vmem:[%s1648_s4] sm:$0xff] %vm731_vm0, %v745_v62 }
 0x1f3   :  { %v720_v19 = vmul.f32 0.6931472, %v1270_v32 }
 0x1f5   :  { %v721_v15 = vsub.f32 %v783_v52, %v720_v19 }
 0x1f7   :  { %730 = vst.msk [vmem:[%s1649_s5] sm:$0xff] %vm729_vm5, %v721_v15 }

</bundles_post_ra>
